<compile_context>
chip_gen: v6e
topology: v6e:2x2x1
jax: 0.10.0
libtpu: 0.0.40
codegen_flags: <defaults>
</compile_context>

<pallas_src>
import functools

import jax
import jax.numpy as jnp
from jax.experimental import pallas as pl
from jax.experimental.pallas import tpu as pltpu


# ----------------------------------------------------------------------------
# Pallas kernel: fused im2col + conv1 as hoisted lane-roll taps + VPU FMAs
# ----------------------------------------------------------------------------
def _conv1_flat_tap_kernel(x_ref, w_ref, b_ref, o_ref, *, c, kh, kw, img_w):
    # x_ref: (N, C, H*W)       VMEM  lane-major flattened input image
    # w_ref: (OC*C*KH*KW,)     SMEM  conv1 weight, PyTorch OIHW order, flat 1-D
    # b_ref: (OC,)             SMEM  conv1 bias
    # o_ref: (N, OC, H*W)      VMEM  lane-dense output slab; the conv result
    #                          lives at flat index y*W + x for y < OH, x < OW,
    #                          the rest is padding the wrapper slices off.
    n, _, hw = x_ref.shape
    _, oc, _ = o_ref.shape
    k = c * kh * kw

    # ---- Hoisted taps (computed once, reused by every output channel).
    # tap[ci,i,j][n, p] == x_flat[n, ci, p + i*W + j]; for every valid output
    # position p = y*W + x (y < OH, x < OW) this equals x[n, ci, y+i, x+j]
    # (no row carry since x + j < W); rolled wrap-around only lands in the
    # padding region that is discarded by the wrapper.
    taps = []
    for ci in range(c):
        x_ci = x_ref[:, ci, :]                                  # (N, H*W)
        for i in range(kh):
            for j in range(kw):
                off = i * img_w + j
                if off == 0:
                    taps.append(x_ci)
                else:
                    # positive modular shift == shift by -off (pull x[p+off]
                    # down to position p); pure lane rotation on the XLU.
                    taps.append(pltpu.roll(x_ci, shift=hw - off, axis=1))

    # ---- Hoisted SMEM scalars (weights + bias) off the hot FMA chain.
    wgt = [[w_ref[o * k + t] for t in range(k)] for o in range(oc)]
    bias = [b_ref[o] for o in range(oc)]

    # ---- OC-outermost accumulation: one live accumulator, stored per
    # channel as soon as it is done (no jnp.stack epilogue, no spills).
    for o in range(oc):
        acc = wgt[o][0] * taps[0]
        for t in range(1, k):
            acc = acc + wgt[o][t] * taps[t]
        o_ref[:, o, :] = (acc + bias[o]).astype(o_ref.dtype)


def layer_out_net_forward(x, conv1_w, conv1_b):
    """Returns conv1(x) — the tensor captured by LayerOutNet's forward hook.

    x:       (N, C, H, W)  float32, NCHW (PyTorch convention)
    conv1_w: (OC, C, KH, KW)
    conv1_b: (OC,)
    returns: (N, OC, OH, OW) with OH = H-KH+1, OW = W-KW+1 (stride 1, no pad)
    """
    n, c, h, w = x.shape
    oc, cw, kh, kw = conv1_w.shape
    assert cw == c
    oh, ow = h - kh + 1, w - kw + 1
    k = c * kh * kw

    # The VPU broadcast-FMA tap path only wins while the contraction depth is
    # shallow (MXU fill/drain dominates at K=9).  Past ~32 taps, switch to
    # im2col + jnp.dot(preferred_element_type=f32) on the MXU instead.
    assert k <= 32, "contraction depth too deep for VPU taps; use im2col + MXU"
    assert kh <= h and kw <= w

    # Contiguous (metadata-only) reshapes in the wrapper.
    x_flat = x.reshape(n, c, h * w)           # lane-major spatial dim (H*W)
    w_flat = conv1_w.reshape(oc * k)          # 1-D SMEM: no (8,128) word padding

    flops = 2 * n * oc * oh * ow * k
    bytes_accessed = (x.size + w_flat.size + conv1_b.size + n * oc * h * w) * 4

    kernel = functools.partial(_conv1_flat_tap_kernel, c=c, kh=kh, kw=kw, img_w=w)
    out_flat = pl.pallas_call(
        kernel,
        out_shape=jax.ShapeDtypeStruct((n, oc, h * w), jnp.float32),
        in_specs=[
            pl.BlockSpec(memory_space=pltpu.MemorySpace.VMEM),   # x (whole array)
            pl.BlockSpec(memory_space=pltpu.MemorySpace.SMEM),   # weights (scalars)
            pl.BlockSpec(memory_space=pltpu.MemorySpace.SMEM),   # bias (scalars)
        ],
        out_specs=pl.BlockSpec(memory_space=pltpu.MemorySpace.VMEM),
        cost_estimate=pl.CostEstimate(
            flops=flops, transcendentals=0, bytes_accessed=bytes_accessed),
    )(x_flat, w_flat, conv1_b)

    # Contiguous reshape, then slice off the conv padding (rows/cols >= OH/OW).
    return out_flat.reshape(n, oc, h, w)[:, :, :oh, :ow]


# TODO(synk): the forward-hook registration itself is a Python side-effect with
# no Pallas equivalent; we return the hooked layer's output (conv1) directly.


if __name__ == "__main__":
    key = jax.random.PRNGKey(0)
    kx, kw_, kb = jax.random.split(key, 3)

    # Small MNIST-like shapes: batch=2, in_channels=1, spatial=16,
    # conv1: Conv2d(1, 8, kernel_size=3, stride=1)  -> the hooked layer.
    N, C, H, W = 2, 1, 16, 16
    OC, KH, KW = 8, 3, 3

    x = jax.random.normal(kx, (N, C, H, W), dtype=jnp.float32)
    conv1_w = 0.1 * jax.random.normal(kw_, (OC, C, KH, KW), dtype=jnp.float32)
    conv1_b = 0.1 * jax.random.normal(kb, (OC,), dtype=jnp.float32)

    out = layer_out_net_forward(x, conv1_w, conv1_b)
    out = jax.block_until_ready(out)

    # Cross-check against XLA's native conv (same semantics as nn.Conv2d).
    ref = jax.lax.conv_general_dilated(
        x, conv1_w, window_strides=(1, 1), padding="VALID",
        dimension_numbers=("NCHW", "OIHW", "NCHW"),
    ) + conv1_b.reshape(1, OC, 1, 1)
    assert out.shape == (N, OC, H - KH + 1, W - KW + 1)
    assert jnp.allclose(out, ref, rtol=1e-4, atol=1e-4)

    print("KERNEL_OK")
</pallas_src>

<mosaic_0001>
module attributes {stable_mosaic.version = 11 : i64} {
  func.func @_conv1_flat_tap_kernel(%arg0: memref<2x1x256xf32, #tpu.memory_space<vmem>>, %arg1: memref<72xf32, #tpu.memory_space<smem>>, %arg2: memref<8xf32, #tpu.memory_space<smem>>, %arg3: memref<2x8x256xf32, #tpu.memory_space<vmem>>) attributes {dimension_semantics = [], scalar_prefetch = 0 : i64, scratch_operands = 0 : i64, tpu.core_type = #tpu.core_type<tc>} {
    %c0 = arith.constant 0 : index
    %c0_0 = arith.constant 0 : index
    %c0_1 = arith.constant 0 : index
    %0 = vector.load %arg0[%c0, %c0_0, %c0_1] : memref<2x1x256xf32, #tpu.memory_space<vmem>>, vector<2x1x256xf32>
    %1 = vector.shape_cast %0 : vector<2x1x256xf32> to vector<2x256xf32>
    %c255_i32 = arith.constant 255 : i32
    %2 = tpu.dynamic_rotate %1 by %c255_i32 dim 1 : vector<2x256xf32>, i32 -> vector<2x256xf32>
    %c254_i32 = arith.constant 254 : i32
    %3 = tpu.dynamic_rotate %1 by %c254_i32 dim 1 : vector<2x256xf32>, i32 -> vector<2x256xf32>
    %c240_i32 = arith.constant 240 : i32
    %4 = tpu.dynamic_rotate %1 by %c240_i32 dim 1 : vector<2x256xf32>, i32 -> vector<2x256xf32>
    %c239_i32 = arith.constant 239 : i32
    %5 = tpu.dynamic_rotate %1 by %c239_i32 dim 1 : vector<2x256xf32>, i32 -> vector<2x256xf32>
    %c238_i32 = arith.constant 238 : i32
    %6 = tpu.dynamic_rotate %1 by %c238_i32 dim 1 : vector<2x256xf32>, i32 -> vector<2x256xf32>
    %c224_i32 = arith.constant 224 : i32
    %7 = tpu.dynamic_rotate %1 by %c224_i32 dim 1 : vector<2x256xf32>, i32 -> vector<2x256xf32>
    %c223_i32 = arith.constant 223 : i32
    %8 = tpu.dynamic_rotate %1 by %c223_i32 dim 1 : vector<2x256xf32>, i32 -> vector<2x256xf32>
    %c222_i32 = arith.constant 222 : i32
    %9 = tpu.dynamic_rotate %1 by %c222_i32 dim 1 : vector<2x256xf32>, i32 -> vector<2x256xf32>
    %c0_2 = arith.constant 0 : index
    %10 = memref.load %arg1[%c0_2] : memref<72xf32, #tpu.memory_space<smem>>
    %c1 = arith.constant 1 : index
    %11 = memref.load %arg1[%c1] : memref<72xf32, #tpu.memory_space<smem>>
    %c2 = arith.constant 2 : index
    %12 = memref.load %arg1[%c2] : memref<72xf32, #tpu.memory_space<smem>>
    %c3 = arith.constant 3 : index
    %13 = memref.load %arg1[%c3] : memref<72xf32, #tpu.memory_space<smem>>
    %c4 = arith.constant 4 : index
    %14 = memref.load %arg1[%c4] : memref<72xf32, #tpu.memory_space<smem>>
    %c5 = arith.constant 5 : index
    %15 = memref.load %arg1[%c5] : memref<72xf32, #tpu.memory_space<smem>>
    %c6 = arith.constant 6 : index
    %16 = memref.load %arg1[%c6] : memref<72xf32, #tpu.memory_space<smem>>
    %c7 = arith.constant 7 : index
    %17 = memref.load %arg1[%c7] : memref<72xf32, #tpu.memory_space<smem>>
    %c8 = arith.constant 8 : index
    %18 = memref.load %arg1[%c8] : memref<72xf32, #tpu.memory_space<smem>>
    %c9 = arith.constant 9 : index
    %19 = memref.load %arg1[%c9] : memref<72xf32, #tpu.memory_space<smem>>
    %c10 = arith.constant 10 : index
    %20 = memref.load %arg1[%c10] : memref<72xf32, #tpu.memory_space<smem>>
    %c11 = arith.constant 11 : index
    %21 = memref.load %arg1[%c11] : memref<72xf32, #tpu.memory_space<smem>>
    %c12 = arith.constant 12 : index
    %22 = memref.load %arg1[%c12] : memref<72xf32, #tpu.memory_space<smem>>
    %c13 = arith.constant 13 : index
    %23 = memref.load %arg1[%c13] : memref<72xf32, #tpu.memory_space<smem>>
    %c14 = arith.constant 14 : index
    %24 = memref.load %arg1[%c14] : memref<72xf32, #tpu.memory_space<smem>>
    %c15 = arith.constant 15 : index
    %25 = memref.load %arg1[%c15] : memref<72xf32, #tpu.memory_space<smem>>
    %c16 = arith.constant 16 : index
    %26 = memref.load %arg1[%c16] : memref<72xf32, #tpu.memory_space<smem>>
    %c17 = arith.constant 17 : index
    %27 = memref.load %arg1[%c17] : memref<72xf32, #tpu.memory_space<smem>>
    %c18 = arith.constant 18 : index
    %28 = memref.load %arg1[%c18] : memref<72xf32, #tpu.memory_space<smem>>
    %c19 = arith.constant 19 : index
    %29 = memref.load %arg1[%c19] : memref<72xf32, #tpu.memory_space<smem>>
    %c20 = arith.constant 20 : index
    %30 = memref.load %arg1[%c20] : memref<72xf32, #tpu.memory_space<smem>>
    %c21 = arith.constant 21 : index
    %31 = memref.load %arg1[%c21] : memref<72xf32, #tpu.memory_space<smem>>
    %c22 = arith.constant 22 : index
    %32 = memref.load %arg1[%c22] : memref<72xf32, #tpu.memory_space<smem>>
    %c23 = arith.constant 23 : index
    %33 = memref.load %arg1[%c23] : memref<72xf32, #tpu.memory_space<smem>>
    %c24 = arith.constant 24 : index
    %34 = memref.load %arg1[%c24] : memref<72xf32, #tpu.memory_space<smem>>
    %c25 = arith.constant 25 : index
    %35 = memref.load %arg1[%c25] : memref<72xf32, #tpu.memory_space<smem>>
    %c26 = arith.constant 26 : index
    %36 = memref.load %arg1[%c26] : memref<72xf32, #tpu.memory_space<smem>>
    %c27 = arith.constant 27 : index
    %37 = memref.load %arg1[%c27] : memref<72xf32, #tpu.memory_space<smem>>
    %c28 = arith.constant 28 : index
    %38 = memref.load %arg1[%c28] : memref<72xf32, #tpu.memory_space<smem>>
    %c29 = arith.constant 29 : index
    %39 = memref.load %arg1[%c29] : memref<72xf32, #tpu.memory_space<smem>>
    %c30 = arith.constant 30 : index
    %40 = memref.load %arg1[%c30] : memref<72xf32, #tpu.memory_space<smem>>
    %c31 = arith.constant 31 : index
    %41 = memref.load %arg1[%c31] : memref<72xf32, #tpu.memory_space<smem>>
    %c32 = arith.constant 32 : index
    %42 = memref.load %arg1[%c32] : memref<72xf32, #tpu.memory_space<smem>>
    %c33 = arith.constant 33 : index
    %43 = memref.load %arg1[%c33] : memref<72xf32, #tpu.memory_space<smem>>
    %c34 = arith.constant 34 : index
    %44 = memref.load %arg1[%c34] : memref<72xf32, #tpu.memory_space<smem>>
    %c35 = arith.constant 35 : index
    %45 = memref.load %arg1[%c35] : memref<72xf32, #tpu.memory_space<smem>>
    %c36 = arith.constant 36 : index
    %46 = memref.load %arg1[%c36] : memref<72xf32, #tpu.memory_space<smem>>
    %c37 = arith.constant 37 : index
    %47 = memref.load %arg1[%c37] : memref<72xf32, #tpu.memory_space<smem>>
    %c38 = arith.constant 38 : index
    %48 = memref.load %arg1[%c38] : memref<72xf32, #tpu.memory_space<smem>>
    %c39 = arith.constant 39 : index
    %49 = memref.load %arg1[%c39] : memref<72xf32, #tpu.memory_space<smem>>
    %c40 = arith.constant 40 : index
    %50 = memref.load %arg1[%c40] : memref<72xf32, #tpu.memory_space<smem>>
    %c41 = arith.constant 41 : index
    %51 = memref.load %arg1[%c41] : memref<72xf32, #tpu.memory_space<smem>>
    %c42 = arith.constant 42 : index
    %52 = memref.load %arg1[%c42] : memref<72xf32, #tpu.memory_space<smem>>
    %c43 = arith.constant 43 : index
    %53 = memref.load %arg1[%c43] : memref<72xf32, #tpu.memory_space<smem>>
    %c44 = arith.constant 44 : index
    %54 = memref.load %arg1[%c44] : memref<72xf32, #tpu.memory_space<smem>>
    %c45 = arith.constant 45 : index
    %55 = memref.load %arg1[%c45] : memref<72xf32, #tpu.memory_space<smem>>
    %c46 = arith.constant 46 : index
    %56 = memref.load %arg1[%c46] : memref<72xf32, #tpu.memory_space<smem>>
    %c47 = arith.constant 47 : index
    %57 = memref.load %arg1[%c47] : memref<72xf32, #tpu.memory_space<smem>>
    %c48 = arith.constant 48 : index
    %58 = memref.load %arg1[%c48] : memref<72xf32, #tpu.memory_space<smem>>
    %c49 = arith.constant 49 : index
    %59 = memref.load %arg1[%c49] : memref<72xf32, #tpu.memory_space<smem>>
    %c50 = arith.constant 50 : index
    %60 = memref.load %arg1[%c50] : memref<72xf32, #tpu.memory_space<smem>>
    %c51 = arith.constant 51 : index
    %61 = memref.load %arg1[%c51] : memref<72xf32, #tpu.memory_space<smem>>
    %c52 = arith.constant 52 : index
    %62 = memref.load %arg1[%c52] : memref<72xf32, #tpu.memory_space<smem>>
    %c53 = arith.constant 53 : index
    %63 = memref.load %arg1[%c53] : memref<72xf32, #tpu.memory_space<smem>>
    %c54 = arith.constant 54 : index
    %64 = memref.load %arg1[%c54] : memref<72xf32, #tpu.memory_space<smem>>
    %c55 = arith.constant 55 : index
    %65 = memref.load %arg1[%c55] : memref<72xf32, #tpu.memory_space<smem>>
    %c56 = arith.constant 56 : index
    %66 = memref.load %arg1[%c56] : memref<72xf32, #tpu.memory_space<smem>>
    %c57 = arith.constant 57 : index
    %67 = memref.load %arg1[%c57] : memref<72xf32, #tpu.memory_space<smem>>
    %c58 = arith.constant 58 : index
    %68 = memref.load %arg1[%c58] : memref<72xf32, #tpu.memory_space<smem>>
    %c59 = arith.constant 59 : index
    %69 = memref.load %arg1[%c59] : memref<72xf32, #tpu.memory_space<smem>>
    %c60 = arith.constant 60 : index
    %70 = memref.load %arg1[%c60] : memref<72xf32, #tpu.memory_space<smem>>
    %c61 = arith.constant 61 : index
    %71 = memref.load %arg1[%c61] : memref<72xf32, #tpu.memory_space<smem>>
    %c62 = arith.constant 62 : index
    %72 = memref.load %arg1[%c62] : memref<72xf32, #tpu.memory_space<smem>>
    %c63 = arith.constant 63 : index
    %73 = memref.load %arg1[%c63] : memref<72xf32, #tpu.memory_space<smem>>
    %c64 = arith.constant 64 : index
    %74 = memref.load %arg1[%c64] : memref<72xf32, #tpu.memory_space<smem>>
    %c65 = arith.constant 65 : index
    %75 = memref.load %arg1[%c65] : memref<72xf32, #tpu.memory_space<smem>>
    %c66 = arith.constant 66 : index
    %76 = memref.load %arg1[%c66] : memref<72xf32, #tpu.memory_space<smem>>
    %c67 = arith.constant 67 : index
    %77 = memref.load %arg1[%c67] : memref<72xf32, #tpu.memory_space<smem>>
    %c68 = arith.constant 68 : index
    %78 = memref.load %arg1[%c68] : memref<72xf32, #tpu.memory_space<smem>>
    %c69 = arith.constant 69 : index
    %79 = memref.load %arg1[%c69] : memref<72xf32, #tpu.memory_space<smem>>
    %c70 = arith.constant 70 : index
    %80 = memref.load %arg1[%c70] : memref<72xf32, #tpu.memory_space<smem>>
    %c71 = arith.constant 71 : index
    %81 = memref.load %arg1[%c71] : memref<72xf32, #tpu.memory_space<smem>>
    %c0_3 = arith.constant 0 : index
    %82 = memref.load %arg2[%c0_3] : memref<8xf32, #tpu.memory_space<smem>>
    %c1_4 = arith.constant 1 : index
    %83 = memref.load %arg2[%c1_4] : memref<8xf32, #tpu.memory_space<smem>>
    %c2_5 = arith.constant 2 : index
    %84 = memref.load %arg2[%c2_5] : memref<8xf32, #tpu.memory_space<smem>>
    %c3_6 = arith.constant 3 : index
    %85 = memref.load %arg2[%c3_6] : memref<8xf32, #tpu.memory_space<smem>>
    %c4_7 = arith.constant 4 : index
    %86 = memref.load %arg2[%c4_7] : memref<8xf32, #tpu.memory_space<smem>>
    %c5_8 = arith.constant 5 : index
    %87 = memref.load %arg2[%c5_8] : memref<8xf32, #tpu.memory_space<smem>>
    %c6_9 = arith.constant 6 : index
    %88 = memref.load %arg2[%c6_9] : memref<8xf32, #tpu.memory_space<smem>>
    %c7_10 = arith.constant 7 : index
    %89 = memref.load %arg2[%c7_10] : memref<8xf32, #tpu.memory_space<smem>>
    %90 = vector.broadcast %10 : f32 to vector<2x256xf32>
    %91 = arith.mulf %90, %1 : vector<2x256xf32>
    %92 = vector.broadcast %11 : f32 to vector<2x256xf32>
    %93 = arith.mulf %92, %2 : vector<2x256xf32>
    %94 = arith.addf %91, %93 : vector<2x256xf32>
    %95 = vector.broadcast %12 : f32 to vector<2x256xf32>
    %96 = arith.mulf %95, %3 : vector<2x256xf32>
    %97 = arith.addf %94, %96 : vector<2x256xf32>
    %98 = vector.broadcast %13 : f32 to vector<2x256xf32>
    %99 = arith.mulf %98, %4 : vector<2x256xf32>
    %100 = arith.addf %97, %99 : vector<2x256xf32>
    %101 = vector.broadcast %14 : f32 to vector<2x256xf32>
    %102 = arith.mulf %101, %5 : vector<2x256xf32>
    %103 = arith.addf %100, %102 : vector<2x256xf32>
    %104 = vector.broadcast %15 : f32 to vector<2x256xf32>
    %105 = arith.mulf %104, %6 : vector<2x256xf32>
    %106 = arith.addf %103, %105 : vector<2x256xf32>
    %107 = vector.broadcast %16 : f32 to vector<2x256xf32>
    %108 = arith.mulf %107, %7 : vector<2x256xf32>
    %109 = arith.addf %106, %108 : vector<2x256xf32>
    %110 = vector.broadcast %17 : f32 to vector<2x256xf32>
    %111 = arith.mulf %110, %8 : vector<2x256xf32>
    %112 = arith.addf %109, %111 : vector<2x256xf32>
    %113 = vector.broadcast %18 : f32 to vector<2x256xf32>
    %114 = arith.mulf %113, %9 : vector<2x256xf32>
    %115 = arith.addf %112, %114 : vector<2x256xf32>
    %116 = vector.broadcast %82 : f32 to vector<2x256xf32>
    %117 = arith.addf %115, %116 : vector<2x256xf32>
    %c0_11 = arith.constant 0 : index
    %c0_12 = arith.constant 0 : index
    %c0_13 = arith.constant 0 : index
    %118 = vector.load %arg3[%c0_11, %c0_12, %c0_13] : memref<2x8x256xf32, #tpu.memory_space<vmem>>, vector<2x1x256xf32>
    %119 = vector.shape_cast %118 : vector<2x1x256xf32> to vector<2x256xf32>
    %120 = vector.shape_cast %117 : vector<2x256xf32> to vector<2x1x256xf32>
    tpu.vector_store %arg3[%c0_11, %c0_12, %c0_13], %120 {strides = array<i32>} : memref<2x8x256xf32, #tpu.memory_space<vmem>>, vector<2x1x256xf32>,
    %121 = vector.broadcast %19 : f32 to vector<2x256xf32>
    %122 = arith.mulf %121, %1 : vector<2x256xf32>
    %123 = vector.broadcast %20 : f32 to vector<2x256xf32>
    %124 = arith.mulf %123, %2 : vector<2x256xf32>
    %125 = arith.addf %122, %124 : vector<2x256xf32>
    %126 = vector.broadcast %21 : f32 to vector<2x256xf32>
    %127 = arith.mulf %126, %3 : vector<2x256xf32>
    %128 = arith.addf %125, %127 : vector<2x256xf32>
    %129 = vector.broadcast %22 : f32 to vector<2x256xf32>
    %130 = arith.mulf %129, %4 : vector<2x256xf32>
    %131 = arith.addf %128, %130 : vector<2x256xf32>
    %132 = vector.broadcast %23 : f32 to vector<2x256xf32>
    %133 = arith.mulf %132, %5 : vector<2x256xf32>
    %134 = arith.addf %131, %133 : vector<2x256xf32>
    %135 = vector.broadcast %24 : f32 to vector<2x256xf32>
    %136 = arith.mulf %135, %6 : vector<2x256xf32>
    %137 = arith.addf %134, %136 : vector<2x256xf32>
    %138 = vector.broadcast %25 : f32 to vector<2x256xf32>
    %139 = arith.mulf %138, %7 : vector<2x256xf32>
    %140 = arith.addf %137, %139 : vector<2x256xf32>
    %141 = vector.broadcast %26 : f32 to vector<2x256xf32>
    %142 = arith.mulf %141, %8 : vector<2x256xf32>
    %143 = arith.addf %140, %142 : vector<2x256xf32>
    %144 = vector.broadcast %27 : f32 to vector<2x256xf32>
    %145 = arith.mulf %144, %9 : vector<2x256xf32>
    %146 = arith.addf %143, %145 : vector<2x256xf32>
    %147 = vector.broadcast %83 : f32 to vector<2x256xf32>
    %148 = arith.addf %146, %147 : vector<2x256xf32>
    %c0_14 = arith.constant 0 : index
    %c1_15 = arith.constant 1 : index
    %c0_16 = arith.constant 0 : index
    %149 = vector.load %arg3[%c0_14, %c1_15, %c0_16] : memref<2x8x256xf32, #tpu.memory_space<vmem>>, vector<2x1x256xf32>
    %150 = vector.shape_cast %149 : vector<2x1x256xf32> to vector<2x256xf32>
    %151 = vector.shape_cast %148 : vector<2x256xf32> to vector<2x1x256xf32>
    tpu.vector_store %arg3[%c0_14, %c1_15, %c0_16], %151 {strides = array<i32>} : memref<2x8x256xf32, #tpu.memory_space<vmem>>, vector<2x1x256xf32>,
    %152 = vector.broadcast %28 : f32 to vector<2x256xf32>
    %153 = arith.mulf %152, %1 : vector<2x256xf32>
    %154 = vector.broadcast %29 : f32 to vector<2x256xf32>
    %155 = arith.mulf %154, %2 : vector<2x256xf32>
    %156 = arith.addf %153, %155 : vector<2x256xf32>
    %157 = vector.broadcast %30 : f32 to vector<2x256xf32>
    %158 = arith.mulf %157, %3 : vector<2x256xf32>
    %159 = arith.addf %156, %158 : vector<2x256xf32>
    %160 = vector.broadcast %31 : f32 to vector<2x256xf32>
    %161 = arith.mulf %160, %4 : vector<2x256xf32>
    %162 = arith.addf %159, %161 : vector<2x256xf32>
    %163 = vector.broadcast %32 : f32 to vector<2x256xf32>
    %164 = arith.mulf %163, %5 : vector<2x256xf32>
    %165 = arith.addf %162, %164 : vector<2x256xf32>
    %166 = vector.broadcast %33 : f32 to vector<2x256xf32>
    %167 = arith.mulf %166, %6 : vector<2x256xf32>
    %168 = arith.addf %165, %167 : vector<2x256xf32>
    %169 = vector.broadcast %34 : f32 to vector<2x256xf32>
    %170 = arith.mulf %169, %7 : vector<2x256xf32>
    %171 = arith.addf %168, %170 : vector<2x256xf32>
    %172 = vector.broadcast %35 : f32 to vector<2x256xf32>
    %173 = arith.mulf %172, %8 : vector<2x256xf32>
    %174 = arith.addf %171, %173 : vector<2x256xf32>
    %175 = vector.broadcast %36 : f32 to vector<2x256xf32>
    %176 = arith.mulf %175, %9 : vector<2x256xf32>
    %177 = arith.addf %174, %176 : vector<2x256xf32>
    %178 = vector.broadcast %84 : f32 to vector<2x256xf32>
    %179 = arith.addf %177, %178 : vector<2x256xf32>
    %c0_17 = arith.constant 0 : index
    %c2_18 = arith.constant 2 : index
    %c0_19 = arith.constant 0 : index
    %180 = vector.load %arg3[%c0_17, %c2_18, %c0_19] : memref<2x8x256xf32, #tpu.memory_space<vmem>>, vector<2x1x256xf32>
    %181 = vector.shape_cast %180 : vector<2x1x256xf32> to vector<2x256xf32>
    %182 = vector.shape_cast %179 : vector<2x256xf32> to vector<2x1x256xf32>
    tpu.vector_store %arg3[%c0_17, %c2_18, %c0_19], %182 {strides = array<i32>} : memref<2x8x256xf32, #tpu.memory_space<vmem>>, vector<2x1x256xf32>,
    %183 = vector.broadcast %37 : f32 to vector<2x256xf32>
    %184 = arith.mulf %183, %1 : vector<2x256xf32>
    %185 = vector.broadcast %38 : f32 to vector<2x256xf32>
    %186 = arith.mulf %185, %2 : vector<2x256xf32>
    %187 = arith.addf %184, %186 : vector<2x256xf32>
    %188 = vector.broadcast %39 : f32 to vector<2x256xf32>
    %189 = arith.mulf %188, %3 : vector<2x256xf32>
    %190 = arith.addf %187, %189 : vector<2x256xf32>
    %191 = vector.broadcast %40 : f32 to vector<2x256xf32>
    %192 = arith.mulf %191, %4 : vector<2x256xf32>
    %193 = arith.addf %190, %192 : vector<2x256xf32>
    %194 = vector.broadcast %41 : f32 to vector<2x256xf32>
    %195 = arith.mulf %194, %5 : vector<2x256xf32>
    %196 = arith.addf %193, %195 : vector<2x256xf32>
    %197 = vector.broadcast %42 : f32 to vector<2x256xf32>
    %198 = arith.mulf %197, %6 : vector<2x256xf32>
    %199 = arith.addf %196, %198 : vector<2x256xf32>
    %200 = vector.broadcast %43 : f32 to vector<2x256xf32>
    %201 = arith.mulf %200, %7 : vector<2x256xf32>
    %202 = arith.addf %199, %201 : vector<2x256xf32>
    %203 = vector.broadcast %44 : f32 to vector<2x256xf32>
    %204 = arith.mulf %203, %8 : vector<2x256xf32>
    %205 = arith.addf %202, %204 : vector<2x256xf32>
    %206 = vector.broadcast %45 : f32 to vector<2x256xf32>
    %207 = arith.mulf %206, %9 : vector<2x256xf32>
    %208 = arith.addf %205, %207 : vector<2x256xf32>
    %209 = vector.broadcast %85 : f32 to vector<2x256xf32>
    %210 = arith.addf %208, %209 : vector<2x256xf32>
    %c0_20 = arith.constant 0 : index
    %c3_21 = arith.constant 3 : index
    %c0_22 = arith.constant 0 : index
    %211 = vector.load %arg3[%c0_20, %c3_21, %c0_22] : memref<2x8x256xf32, #tpu.memory_space<vmem>>, vector<2x1x256xf32>
    %212 = vector.shape_cast %211 : vector<2x1x256xf32> to vector<2x256xf32>
    %213 = vector.shape_cast %210 : vector<2x256xf32> to vector<2x1x256xf32>
    tpu.vector_store %arg3[%c0_20, %c3_21, %c0_22], %213 {strides = array<i32>} : memref<2x8x256xf32, #tpu.memory_space<vmem>>, vector<2x1x256xf32>,
    %214 = vector.broadcast %46 : f32 to vector<2x256xf32>
    %215 = arith.mulf %214, %1 : vector<2x256xf32>
    %216 = vector.broadcast %47 : f32 to vector<2x256xf32>
    %217 = arith.mulf %216, %2 : vector<2x256xf32>
    %218 = arith.addf %215, %217 : vector<2x256xf32>
    %219 = vector.broadcast %48 : f32 to vector<2x256xf32>
    %220 = arith.mulf %219, %3 : vector<2x256xf32>
    %221 = arith.addf %218, %220 : vector<2x256xf32>
    %222 = vector.broadcast %49 : f32 to vector<2x256xf32>
    %223 = arith.mulf %222, %4 : vector<2x256xf32>
    %224 = arith.addf %221, %223 : vector<2x256xf32>
    %225 = vector.broadcast %50 : f32 to vector<2x256xf32>
    %226 = arith.mulf %225, %5 : vector<2x256xf32>
    %227 = arith.addf %224, %226 : vector<2x256xf32>
    %228 = vector.broadcast %51 : f32 to vector<2x256xf32>
    %229 = arith.mulf %228, %6 : vector<2x256xf32>
    %230 = arith.addf %227, %229 : vector<2x256xf32>
    %231 = vector.broadcast %52 : f32 to vector<2x256xf32>
    %232 = arith.mulf %231, %7 : vector<2x256xf32>
    %233 = arith.addf %230, %232 : vector<2x256xf32>
    %234 = vector.broadcast %53 : f32 to vector<2x256xf32>
    %235 = arith.mulf %234, %8 : vector<2x256xf32>
    %236 = arith.addf %233, %235 : vector<2x256xf32>
    %237 = vector.broadcast %54 : f32 to vector<2x256xf32>
    %238 = arith.mulf %237, %9 : vector<2x256xf32>
    %239 = arith.addf %236, %238 : vector<2x256xf32>
    %240 = vector.broadcast %86 : f32 to vector<2x256xf32>
    %241 = arith.addf %239, %240 : vector<2x256xf32>
    %c0_23 = arith.constant 0 : index
    %c4_24 = arith.constant 4 : index
    %c0_25 = arith.constant 0 : index
    %242 = vector.load %arg3[%c0_23, %c4_24, %c0_25] : memref<2x8x256xf32, #tpu.memory_space<vmem>>, vector<2x1x256xf32>
    %243 = vector.shape_cast %242 : vector<2x1x256xf32> to vector<2x256xf32>
    %244 = vector.shape_cast %241 : vector<2x256xf32> to vector<2x1x256xf32>
    tpu.vector_store %arg3[%c0_23, %c4_24, %c0_25], %244 {strides = array<i32>} : memref<2x8x256xf32, #tpu.memory_space<vmem>>, vector<2x1x256xf32>,
    %245 = vector.broadcast %55 : f32 to vector<2x256xf32>
    %246 = arith.mulf %245, %1 : vector<2x256xf32>
    %247 = vector.broadcast %56 : f32 to vector<2x256xf32>
    %248 = arith.mulf %247, %2 : vector<2x256xf32>
    %249 = arith.addf %246, %248 : vector<2x256xf32>
    %250 = vector.broadcast %57 : f32 to vector<2x256xf32>
    %251 = arith.mulf %250, %3 : vector<2x256xf32>
    %252 = arith.addf %249, %251 : vector<2x256xf32>
    %253 = vector.broadcast %58 : f32 to vector<2x256xf32>
    %254 = arith.mulf %253, %4 : vector<2x256xf32>
    %255 = arith.addf %252, %254 : vector<2x256xf32>
    %256 = vector.broadcast %59 : f32 to vector<2x256xf32>
    %257 = arith.mulf %256, %5 : vector<2x256xf32>
    %258 = arith.addf %255, %257 : vector<2x256xf32>
    %259 = vector.broadcast %60 : f32 to vector<2x256xf32>
    %260 = arith.mulf %259, %6 : vector<2x256xf32>
    %261 = arith.addf %258, %260 : vector<2x256xf32>
    %262 = vector.broadcast %61 : f32 to vector<2x256xf32>
    %263 = arith.mulf %262, %7 : vector<2x256xf32>
    %264 = arith.addf %261, %263 : vector<2x256xf32>
    %265 = vector.broadcast %62 : f32 to vector<2x256xf32>
    %266 = arith.mulf %265, %8 : vector<2x256xf32>
    %267 = arith.addf %264, %266 : vector<2x256xf32>
    %268 = vector.broadcast %63 : f32 to vector<2x256xf32>
    %269 = arith.mulf %268, %9 : vector<2x256xf32>
    %270 = arith.addf %267, %269 : vector<2x256xf32>
    %271 = vector.broadcast %87 : f32 to vector<2x256xf32>
    %272 = arith.addf %270, %271 : vector<2x256xf32>
    %c0_26 = arith.constant 0 : index
    %c5_27 = arith.constant 5 : index
    %c0_28 = arith.constant 0 : index
    %273 = vector.load %arg3[%c0_26, %c5_27, %c0_28] : memref<2x8x256xf32, #tpu.memory_space<vmem>>, vector<2x1x256xf32>
    %274 = vector.shape_cast %273 : vector<2x1x256xf32> to vector<2x256xf32>
    %275 = vector.shape_cast %272 : vector<2x256xf32> to vector<2x1x256xf32>
    tpu.vector_store %arg3[%c0_26, %c5_27, %c0_28], %275 {strides = array<i32>} : memref<2x8x256xf32, #tpu.memory_space<vmem>>, vector<2x1x256xf32>,
    %276 = vector.broadcast %64 : f32 to vector<2x256xf32>
    %277 = arith.mulf %276, %1 : vector<2x256xf32>
    %278 = vector.broadcast %65 : f32 to vector<2x256xf32>
    %279 = arith.mulf %278, %2 : vector<2x256xf32>
    %280 = arith.addf %277, %279 : vector<2x256xf32>
    %281 = vector.broadcast %66 : f32 to vector<2x256xf32>
    %282 = arith.mulf %281, %3 : vector<2x256xf32>
    %283 = arith.addf %280, %282 : vector<2x256xf32>
    %284 = vector.broadcast %67 : f32 to vector<2x256xf32>
    %285 = arith.mulf %284, %4 : vector<2x256xf32>
    %286 = arith.addf %283, %285 : vector<2x256xf32>
    %287 = vector.broadcast %68 : f32 to vector<2x256xf32>
    %288 = arith.mulf %287, %5 : vector<2x256xf32>
    %289 = arith.addf %286, %288 : vector<2x256xf32>
    %290 = vector.broadcast %69 : f32 to vector<2x256xf32>
    %291 = arith.mulf %290, %6 : vector<2x256xf32>
    %292 = arith.addf %289, %291 : vector<2x256xf32>
    %293 = vector.broadcast %70 : f32 to vector<2x256xf32>
    %294 = arith.mulf %293, %7 : vector<2x256xf32>
    %295 = arith.addf %292, %294 : vector<2x256xf32>
    %296 = vector.broadcast %71 : f32 to vector<2x256xf32>
    %297 = arith.mulf %296, %8 : vector<2x256xf32>
    %298 = arith.addf %295, %297 : vector<2x256xf32>
    %299 = vector.broadcast %72 : f32 to vector<2x256xf32>
    %300 = arith.mulf %299, %9 : vector<2x256xf32>
    %301 = arith.addf %298, %300 : vector<2x256xf32>
    %302 = vector.broadcast %88 : f32 to vector<2x256xf32>
    %303 = arith.addf %301, %302 : vector<2x256xf32>
    %c0_29 = arith.constant 0 : index
    %c6_30 = arith.constant 6 : index
    %c0_31 = arith.constant 0 : index
    %304 = vector.load %arg3[%c0_29, %c6_30, %c0_31] : memref<2x8x256xf32, #tpu.memory_space<vmem>>, vector<2x1x256xf32>
    %305 = vector.shape_cast %304 : vector<2x1x256xf32> to vector<2x256xf32>
    %306 = vector.shape_cast %303 : vector<2x256xf32> to vector<2x1x256xf32>
    tpu.vector_store %arg3[%c0_29, %c6_30, %c0_31], %306 {strides = array<i32>} : memref<2x8x256xf32, #tpu.memory_space<vmem>>, vector<2x1x256xf32>,
    %307 = vector.broadcast %73 : f32 to vector<2x256xf32>
    %308 = arith.mulf %307, %1 : vector<2x256xf32>
    %309 = vector.broadcast %74 : f32 to vector<2x256xf32>
    %310 = arith.mulf %309, %2 : vector<2x256xf32>
    %311 = arith.addf %308, %310 : vector<2x256xf32>
    %312 = vector.broadcast %75 : f32 to vector<2x256xf32>
    %313 = arith.mulf %312, %3 : vector<2x256xf32>
    %314 = arith.addf %311, %313 : vector<2x256xf32>
    %315 = vector.broadcast %76 : f32 to vector<2x256xf32>
    %316 = arith.mulf %315, %4 : vector<2x256xf32>
    %317 = arith.addf %314, %316 : vector<2x256xf32>
    %318 = vector.broadcast %77 : f32 to vector<2x256xf32>
    %319 = arith.mulf %318, %5 : vector<2x256xf32>
    %320 = arith.addf %317, %319 : vector<2x256xf32>
    %321 = vector.broadcast %78 : f32 to vector<2x256xf32>
    %322 = arith.mulf %321, %6 : vector<2x256xf32>
    %323 = arith.addf %320, %322 : vector<2x256xf32>
    %324 = vector.broadcast %79 : f32 to vector<2x256xf32>
    %325 = arith.mulf %324, %7 : vector<2x256xf32>
    %326 = arith.addf %323, %325 : vector<2x256xf32>
    %327 = vector.broadcast %80 : f32 to vector<2x256xf32>
    %328 = arith.mulf %327, %8 : vector<2x256xf32>
    %329 = arith.addf %326, %328 : vector<2x256xf32>
    %330 = vector.broadcast %81 : f32 to vector<2x256xf32>
    %331 = arith.mulf %330, %9 : vector<2x256xf32>
    %332 = arith.addf %329, %331 : vector<2x256xf32>
    %333 = vector.broadcast %89 : f32 to vector<2x256xf32>
    %334 = arith.addf %332, %333 : vector<2x256xf32>
    %c0_32 = arith.constant 0 : index
    %c7_33 = arith.constant 7 : index
    %c0_34 = arith.constant 0 : index
    %335 = vector.load %arg3[%c0_32, %c7_33, %c0_34] : memref<2x8x256xf32, #tpu.memory_space<vmem>>, vector<2x1x256xf32>
    %336 = vector.shape_cast %335 : vector<2x1x256xf32> to vector<2x256xf32>
    %337 = vector.shape_cast %334 : vector<2x256xf32> to vector<2x1x256xf32>
    tpu.vector_store %arg3[%c0_32, %c7_33, %c0_34], %337 {strides = array<i32>} : memref<2x8x256xf32, #tpu.memory_space<vmem>>, vector<2x1x256xf32>,
    return
  }
}

</mosaic_0001>

<bundles_post_ra>
// kernel: tpu_custom_call.1
= control target key start
LH: loop header
LB: loop body
LE: loop exit
PB: predicated region body
PF: predicated region fallthrough
CT: control target
= control target key end

     0   :  { %s3986_s0 = inlined_call_operand.hbm [shape: f32[2,1,256], index: 0, kind: input, shape index: {}]   ;;  %s3987_s1 = inlined_call_operand.vmem [shape: f32[72], index: 1, kind: input, shape index: {}]   ;;  %s3988_s2 = inlined_call_operand.vmem [shape: f32[8], index: 2, kind: input, shape index: {}]   ;;  %s3989_s3 = inlined_call_operand.hbm [shape: f32[2,8,256], index: 3, kind: output, shape index: {}]  }
   0x1   :  { %4071 = sst [smem:[#allocation83_spill]] %s3989_s3 }
   0x2   :  { %8 = vsyncpa [#allocation3], 0 }
   0x3   :  { %9 = vsyncpa [#allocation5], 0 }
   0x4   :  { %10 = vsyncpa [#allocation8], 0 }
   0x5   :  { %11 = vsyncpa [#allocation4], 0  ;;  %s2554_s12 = smov [#allocation2]   ;;  %s30_s16 = sshll.u32 %s3987_s1, 4  ;;  %s31_s16 = int_to_ptr.vmem [resolvable:$true] %s30_s16 }
   0x6   :  { %s17_s13 = sshll.u32 %s2554_s12, 4  ;;  %s18_s13 = int_to_ptr.vmem [resolvable:$true] %s17_s13 }
   0x7   :  { %s2490_s17 = scalar_lea.vmem %s18_s13, 64  ;;  %p2495_p1 = scmp.lt.s32.totalorder %s18_s13, %s18_s13 }
   0x8   :  { %p2491_p0 = scmp.ne.s32.totalorder %s18_s13, %s2490_s17  ;;  %p2496_p2 = scmp.lt.s32.totalorder %s2490_s17, %s2490_s17 }
   0xa   :  { %p2497_p3 = por %p2496_p2, %p2495_p1 }
   0xc   :  { %p2498_p4 = pnand %p2497_p3, %p2491_p0 }
   0xe   :  { %2501 = shalt.err (!%p2498_p4)
}
   0xf   :  { %s2555_s18 = smov 32   ;;  %s2556_s19 = smov 2  }
  0x10   :  { %23 = dma.hbm_to_vmem [thread:$0]  %s3986_s0, 64, %s18_s13, [#allocation3], %s2555_s18, %s2555_s18, %s2556_s19  }
  0x11   :  { %s2502_s22 = scalar_lea.vmem %s31_s16, 16  ;;  %p2507_p6 = scmp.lt.s32.totalorder %s31_s16, %s31_s16 }
  0x12   :  { %p2503_p5 = scmp.ne.s32.totalorder %s31_s16, %s2502_s22  ;;  %p2508_p7 = scmp.lt.s32.totalorder %s2502_s22, %s2502_s22 }
  0x14   :  { %p2509_p8 = por %p2508_p7, %p2507_p6 }
  0x16   :  { %p2510_p9 = pnand %p2509_p8, %p2503_p5 }
  0x18   :  { %2513 = shalt.err (!%p2510_p9)
}
  0x19   :  { %s2557_s1 = smov [#allocation6]   ;;  %s40_s25 = sshll.u32 %s3988_s2, 4  ;;  %s41_s25 = int_to_ptr.vmem [resolvable:$true] %s40_s25 }
  0x1a   :  { %33 = dma.vmem_to_smem %s31_s16, 16, %s2557_s1, [#allocation5]  }
  0x1b   :  { %s2514_s26 = scalar_lea.vmem %s41_s25, 16  ;;  %p2519_p11 = scmp.lt.s32.totalorder %s41_s25, %s41_s25 }
  0x1c   :  { %p2515_p10 = scmp.ne.s32.totalorder %s41_s25, %s2514_s26  ;;  %p2520_p12 = scmp.lt.s32.totalorder %s2514_s26, %s2514_s26 }
  0x1e   :  { %p2521_p13 = por %p2520_p12, %p2519_p11 }
  0x20   :  { %p2522_p0 = pnand %p2521_p13, %p2515_p10 }
  0x22   :  { %2525 = shalt.err (!%p2522_p0)
}
  0x23   :  { %s2558_s0 = smov [#allocation7]  }
  0x24   :  { %43 = dma.vmem_to_smem %s41_s25, 16, %s2558_s0, [#allocation8]  }
  0x25   :  { %2546 = dma.done.wait [#allocation3], 64  }
  0x26   :  { %2547 = vsyncadd [#allocation3], 4294967232 }
  0x27   :  { %2548 = dma.done.wait [#allocation5], 16  }
  0x28   :  { %2549 = vsyncadd [#allocation5], 4294967280 }
  0x29   :  { %2550 = dma.done.wait [#allocation8], 16  }
  0x2a   :  { %2551 = vsyncadd [#allocation8], 4294967280 }
  0x2b   :  { %53 = sfence }
  0x2c   :  { %v2600_v0 = vld [vmem:[#allocation2] sm:$0x3]  ;;  %v2602_v1 = vld [vmem:[#allocation2 + $0x2] sm:$0x3]  ;;  %v4046_v2 = vlaneseq  ;;  %v2559_v3 = vmov 1966171168  }
  0x2d   :  { %v60_v4 = vunpack.c.l.s4 %v2559_v3  ;;  %v58_v6 = vcombine.low %v2600_v0, %v2602_v1  ;;  %s2560_s2 = smov 126   ;;  %s2561_s27 = smov 127  }
  0x2e   :  { %v63_v5 = vshrl.u32 %v4046_v2, 7  ;;  %s2562_s28 = smov 112   ;;  %s2563_s29 = smov 111   ;;  %v2707_v13 = vand.u32 127, %v4046_v2 }
  0x2f   :  { %v61_v7 = vunpack.c.0.s8 %v60_v4  ;;  %s2564_s30 = smov 110   ;;  %s2565_s4 = smov 96  }
  0x30   :  { %s2566_s5 = smov 95   ;;  %s2567_s6 = smov 94   ;;  %vm96_vm0 = vcmp.lt.s32.totalorder %v2707_v13, 126  ;;  %vm103_vm1 = vcmp.lt.s32.totalorder %v2707_v13, 112  ;;  %vm110_vm2 = vcmp.lt.s32.totalorder %v2707_v13, 111  ;;  %vm89_vm3 = vcmp.lt.s32.totalorder %v2707_v13, 127 }
  0x31   :  { %v2607_v8 = vsub.s32 %v61_v7, %v63_v5  ;;  %s2612_s7 = sld [smem:[#allocation6 + $0x2]]  ;;  %vm117_vm4 = vcmp.lt.s32.totalorder %v2707_v13, 110  ;;  %vm124_vm5 = vcmp.lt.s32.totalorder %v2707_v13, 96  ;;  %vm131_vm6 = vcmp.lt.s32.totalorder %v2707_v13, 95 }
  0x32   :  { %s2614_s8 = sld [smem:[#allocation6 + $0xb]]  ;;  %vm138_vm7 = vcmp.lt.s32.totalorder %v2707_v13, 94 }
  0x33   :  { %v65_v9 = vrot.slane %v58_v6, %v2607_v8  ;;  %s2616_s9 = sld [smem:[#allocation6 + $0x14]] }
  0x34   :  { %s2618_s10 = sld [smem:[#allocation6 + $0x1d]] }
  0x35   :  { %v73_v10 = vrot.slane %v65_v9, %v2607_v8  ;;  %v66_v11 = vcombine.high %v65_v9, %v65_v9  ;;  %s2620_s11 = sld [smem:[#allocation6 + $0x26]] }
  0x36   :  { %s2622_s12 = sld [smem:[#allocation6 + $0x2f]] }
  0x37   :  { %92 = vrot.lane.b32.xlu1 %v73_v10, %s2560_s2  ;;  %83 = vrot.lane.b32.xlu0 %v73_v10, %s2561_s27  ;;  %v80_v12 = vrot.slane %v66_v11, %v2607_v8  ;;  %4072 = sst [smem:[#allocation14_spill]] %s2612_s7  ;;  %v256_v14 = vstv %s2612_s7 }
  0x38   :  { %s2624_s13 = sld [smem:[#allocation6 + $0x38]]  ;;  %v527_v15 = vstv %s2614_s8 }
  0x39   :  { %4073 = sst [smem:[#allocation15_spill]] %s2616_s9  ;;  %v795_v16 = vstv %s2616_s9 }
  0x3a   :  { %4074 = sst [smem:[#allocation16_spill]] %s2618_s10  ;;  %v1063_v17 = vstv %s2618_s10 }
  0x3b   :  { %99 = vrot.lane.b32.xlu0 %v73_v10, %s2562_s28  ;;  %94 = vrot.lane.b32.xlu1 %v80_v12, %s2560_s2  ;;  %4075 = sst [smem:[#allocation17_spill]] %s2620_s11  ;;  %v1331_v18 = vstv %s2620_s11 }
  0x3c   :  { %4076 = sst [smem:[#allocation18_spill]] %s2622_s12  ;;  %v1599_v19 = vstv %s2622_s12 }
  0x3d   :  { %s2626_s14 = sld [smem:[#allocation6 + $0x41]] }
  0x3e   :  { %4077 = sst [smem:[#allocation19_spill]] %s2624_s13  ;;  %v1867_v20 = vstv %s2624_s13 }
  0x3f   :  { %106 = vrot.lane.b32.xlu0 %v73_v10, %s2563_s29  ;;  %101 = vrot.lane.b32.xlu1 %v80_v12, %s2562_s28  ;;  %s2628_s15 = sld [smem:[#allocation6 + $0x3]] }
  0x40   :  { %s2630_s16 = sld [smem:[#allocation6 + $0xc]] }
  0x41   :  { %s2632_s17 = sld [smem:[#allocation6 + $0x15]] }
  0x42   :  { %s2634_s18 = sld [smem:[#allocation6 + $0x1e]] }
  0x43   :  { %108 = vrot.lane.b32.xlu1 %v80_v12, %s2563_s29  ;;  %85 = vrot.lane.b32.xlu0 %v80_v12, %s2561_s27  ;;  %4078 = sst [smem:[#allocation20_spill]] %s2626_s14  ;;  %v2135_v21 = vstv %s2626_s14 }
  0x44   :  { %s2636_s19 = sld [smem:[#allocation6 + $0x27]] }
  0x45   :  { %4079 = sst [smem:[#allocation21_spill]] %s2628_s15  ;;  %v288_v22 = vstv %s2628_s15 }
  0x46   :  { %4080 = sst [smem:[#allocation22_spill]] %s2630_s16  ;;  %v559_v23 = vstv %s2630_s16 }
  0x47   :  { %115 = vrot.lane.b32.xlu1 %v80_v12, %s2564_s30  ;;  %113 = vrot.lane.b32.xlu0 %v73_v10, %s2564_s30  ;;  %4081 = sst [smem:[#allocation23_spill]] %s2632_s17  ;;  %v827_v24 = vstv %s2632_s17 }
  0x48   :  { %4082 = sst [smem:[#allocation24_spill]] %s2634_s18  ;;  %v1095_v25 = vstv %s2634_s18 }
  0x49   :  { %s2638_s20 = sld [smem:[#allocation6 + $0x30]] }
  0x4a   :  { %4083 = sst [smem:[#allocation25_spill]] %s2636_s19  ;;  %v1363_v26 = vstv %s2636_s19 }
  0x4b   :  { %122 = vrot.lane.b32.xlu1 %v80_v12, %s2565_s4  ;;  %120 = vrot.lane.b32.xlu0 %v73_v10, %s2565_s4  ;;  %s2640_s21 = sld [smem:[#allocation6 + $0x39]] }
  0x4c   :  { %s2642_s22 = sld [smem:[#allocation6 + $0x42]] }
  0x4d   :  { %s2644_s1 = sld [smem:[#allocation6 + $0x4]] }
  0x4e   :  { %s2646_s23 = sld [smem:[#allocation6 + $0xd]] }
  0x4f   :  { %129 = vrot.lane.b32.xlu1 %v80_v12, %s2566_s5  ;;  %127 = vrot.lane.b32.xlu0 %v73_v10, %s2566_s5  ;;  %4084 = sst [smem:[#allocation26_spill]] %s2638_s20  ;;  %v1631_v27 = vstv %s2638_s20 }
  0x50   :  { %s2648_s24 = sld [smem:[#allocation6 + $0x16]] }
  0x51   :  { %4085 = sst [smem:[#allocation27_spill]] %s2640_s21  ;;  %v1899_v28 = vstv %s2640_s21 }
  0x52   :  { %4086 = sst [smem:[#allocation28_spill]] %s2642_s22  ;;  %v2167_v29 = vstv %s2642_s22 }
  0x53   :  { %136 = vrot.lane.b32.xlu1 %v80_v12, %s2567_s6  ;;  %134 = vrot.lane.b32.xlu0 %v73_v10, %s2567_s6  ;;  %4087 = sst [smem:[#allocation29_spill]] %s2644_s1  ;;  %v320_v30 = vstv %s2644_s1 }
  0x54   :  { %s2650_s25 = sld [smem:[#allocation6 + $0x1f]]  ;;  %v591_v31 = vstv %s2646_s23 }
  0x55   :  { %s2652_s26 = sld [smem:[#allocation6 + $0x28]] }
  0x56   :  { %4088 = sst [smem:[#allocation30_spill]] %s2648_s24  ;;  %v859_v32 = vstv %s2648_s24 }
  0x57   :  { %s2654_s0 = sld [smem:[#allocation6 + $0x31]] }
  0x58   :  { %s2656_s2 = sld [smem:[#allocation6 + $0x3a]] }
  0x59   :  { %s2658_s27 = sld [smem:[#allocation6 + $0x43]] }
  0x5a   :  { %4089 = sst [smem:[#allocation31_spill]] %s2650_s25 }
  0x5b   :  { %4090 = sst [smem:[#allocation32_spill]] %s2652_s26 }
  0x5c   :  { %s2660_s28 = sld [smem:[#allocation6 + $0x1]] }
  0x5d   :  { %4091 = sst [smem:[#allocation33_spill]] %s2654_s0 }
  0x5e   :  { %4092 = sst [smem:[#allocation34_spill]] %s2656_s2 }
  0x5f   :  { %4093 = sst [smem:[#allocation35_spill]] %s2658_s27 }
  0x60   :  { %s2662_s29 = sld [smem:[#allocation6 + $0xa]] }
  0x61   :  { %s2664_s30 = sld [smem:[#allocation6 + $0x13]] }
  0x62   :  { %4094 = sst [smem:[#allocation36_spill]] %s2660_s28 }
  0x63   :  { %s2666_s4 = sld [smem:[#allocation6 + $0x1c]] }
  0x64   :  { %s2668_s5 = sld [smem:[#allocation6 + $0x25]] }
  0x65   :  { %s2670_s6 = sld [smem:[#allocation6 + $0x2e]] }
  0x66   :  { %4095 = sst [smem:[#allocation37_spill]] %s2662_s29 }
  0x67   :  { %4096 = sst [smem:[#allocation38_spill]] %s2664_s30 }
  0x68   :  { %s2672_s3 = sld [smem:[#allocation6]] }
  0x69   :  { %4097 = sst [smem:[#allocation39_spill]] %s2666_s4 }
  0x6a   :  { %4098 = sst [smem:[#allocation40_spill]] %s2668_s5 }
  0x6b   :  { %4099 = sst [smem:[#allocation41_spill]] %s2670_s6 }
  0x6c   :  { %s2674_s26 = sld [smem:[#allocation6 + $0x9]] }
  0x6d   :  { %s2676_s0 = sld [smem:[#allocation6 + $0x12]] }
  0x6e   :  { %s2678_s27 = sld [smem:[#allocation6 + $0x1b]]  ;;  %v221_v38 = vstv %s2672_s3 }
  0x6f   :  { %s2680_s28 = sld [smem:[#allocation6 + $0x24]]  ;;  %v2762_v47 = vmul.f32 %v221_v38, %v2600_v0  ;;  %v2770_v51 = vmul.f32 %v221_v38, %v2602_v1 }
  0x70   :  { %s2682_s29 = sld [smem:[#allocation6 + $0x2d]] }
  0x71   :  { %s2684_s4 = sld [smem:[#allocation6 + $0x36]] }
  0x72   :  { %s2686_s5 = sld [smem:[#allocation6 + $0x37]]  ;;  %v492_v40 = vstv %s2674_s26 }
  0x73   :  { %4100 = sst [smem:[#allocation42_spill]] %s2676_s0  ;;  %v2773_v52 = vmul.f32 %v492_v40, %v2600_v0  ;;  %v2776_v53 = vmul.f32 %v492_v40, %v2602_v1 }
  0x74   :  { %4101 = sst [smem:[#allocation43_spill]] %s2678_s27 }
  0x75   :  { %4102 = sst [smem:[#allocation44_spill]] %s2680_s28 }
  0x76   :  { %4103 = sst [smem:[#allocation45_spill]] %s2682_s29 }
  0x77   :  { %4104 = sst [smem:[#allocation46_spill]] %s2684_s4 }
  0x78   :  { %4105 = sst [smem:[#allocation47_spill]] %s2686_s5 }
  0x79   :  { %s2688_s6 = sld [smem:[#allocation6 + $0x3f]] }
  0x7a   :  { %s2690_s30 = sld [smem:[#allocation6 + $0x40]] }
  0x7b   :  { %s2692_s0 = sld [smem:[#allocation6 + $0x5]] }
  0x7c   :  { %s2694_s27 = sld [smem:[#allocation6 + $0xe]] }
  0x7d   :  { %s2696_s28 = sld [smem:[#allocation6 + $0x17]] }
  0x7e   :  { %s2698_s29 = sld [smem:[#allocation6 + $0x20]] }
  0x7f   :  { %4106 = sst [smem:[#allocation48_spill]] %s2688_s6 }
  0x80   :  { %4107 = sst [smem:[#allocation49_spill]] %s2690_s30 }
  0x81   :  { %4108 = sst [smem:[#allocation50_spill]] %s2692_s0 }
  0x82   :  { %4109 = sst [smem:[#allocation51_spill]] %s2694_s27 }
  0x83   :  { %s2700_s4 = sld [smem:[#allocation6 + $0x29]] }
  0x84   :  { %s2702_s5 = sld [smem:[#allocation6 + $0x32]] }
  0x85   :  { %s2704_s6 = sld [smem:[#allocation6 + $0x3b]] }
  0x86   :  { %s2710_s27 = sld [smem:[#allocation6 + $0x44]] }
  0x87   :  { %s2722_s7 = sld [smem:[#allocation6 + $0xf]] }
  0x88   :  { %s2728_s11 = sld [smem:[#allocation6 + $0x18]] }
  0x89   :  { %4110 = sst [smem:[#allocation52_spill]] %s2700_s4 }
  0x8a   :  { %4111 = sst [smem:[#allocation53_spill]] %s2702_s5 }
  0x8b   :  { %4112 = sst [smem:[#allocation54_spill]] %s2704_s6 }
  0x8c   :  { %4113 = sst [smem:[#allocation55_spill]] %s2710_s27 }
  0x8d   :  { %s2716_s5 = sld [smem:[#allocation6 + $0x6]] }
  0x8e   :  { %s4115_s6 = sld [smem:[#allocation32_spill]] }
  0x8f   :  { %s4116_s27 = sld [smem:[#allocation33_spill]] }
  0x90   :  { %s4118_s10 = sld [smem:[#allocation36_spill]] }
  0x91   :  { %s4119_s13 = sld [smem:[#allocation37_spill]] }
  0x92   :  { %s4120_s14 = sld [smem:[#allocation38_spill]] }
  0x93   :  { %4114 = sst [smem:[#allocation56_spill]] %s2716_s5 }
  0x94   :  { %s2734_s15 = sld [smem:[#allocation6 + $0x21]] }
  0x95   :  { %s4121_s16 = sld [smem:[#allocation42_spill]] }
  0x96   :  { %s4122_s17 = sld [smem:[#allocation43_spill]] }
  0x97   :  { %s2740_s12 = sld [smem:[#allocation6 + $0x2a]] }
  0x98   :  { %s4126_s20 = sld [smem:[#allocation44_spill]] }
  0x99   :  { %s4127_s21 = sld [smem:[#allocation45_spill]] }
  0x9a   :  { %s2746_s1 = sld [smem:[#allocation6 + $0x33]] }
  0x9b   :  { %s4130_s24 = sld [smem:[#allocation46_spill]]  ;;  %v760_v43 = vstv %s4121_s16 }
  0x9c   :  { %s2752_s25 = sld [smem:[#allocation6 + $0x3c]]  ;;  %v1028_v44 = vstv %s4122_s17  ;;  %v2782_v55 = vmul.f32 %v760_v43, %v2600_v0  ;;  %v2785_v56 = vmul.f32 %v760_v43, %v2602_v1 }
  0x9d   :  { %4125 = sst [smem:[#allocation32_spill]] %s2740_s12  ;;  %v2788_v57 = vmul.f32 %v1028_v44, %v2600_v0  ;;  %v2794_v59 = vmul.f32 %v1028_v44, %v2602_v1 }
  0x9e   :  { %s4131_s2 = sld [smem:[#allocation48_spill]]  ;;  %v1296_v48 = vstv %s4126_s20 }
  0x9f   :  { %s2759_s9 = sld [smem:[#allocation6 + $0x45]]  ;;  %v1564_v49 = vstv %s4127_s21  ;;  %v2797_v60 = vmul.f32 %v1296_v48, %v2600_v0  ;;  %v2800_v61 = vmul.f32 %v1296_v48, %v2602_v1 }
  0xa0   :  { %4129 = sst [smem:[#allocation33_spill]] %s2746_s1  ;;  %v2803_v62 = vmul.f32 %v1564_v49, %v2600_v0  ;;  %v2808_v63 = vmul.f32 %v1564_v49, %v2602_v1 }
  0xa1   :  { %s2767_s3 = sld [smem:[#allocation6 + $0x7]]  ;;  %v1832_v54 = vstv %s4130_s24 }
  0xa2   :  { %s2779_s17 = sld [smem:[#allocation6 + $0x10]]  ;;  %v2811_v3 = vmul.f32 %v1832_v54, %v2600_v0  ;;  %v2814_v4 = vmul.f32 %v1832_v54, %v2602_v1 }
  0xa3   :  { %s2791_s20 = sld [smem:[#allocation6 + $0x19]] }
  0xa4   :  { %v2100_v58 = vstv %s4131_s2  ;;  %s4135_s21 = sld [smem:[#allocation51_spill]] }
  0xa5   :  { %4132 = sst [smem:[#allocation36_spill]] %s2759_s9  ;;  %v2820_v7 = vmul.f32 %v2100_v58, %v2600_v0  ;;  %v2823_v9 = vmul.f32 %v2100_v58, %v2602_v1 }
  0xa6   :  { %s2805_s24 = sld [smem:[#allocation6 + $0x22]] }
  0xa7   :  { %4133 = sst [smem:[#allocation37_spill]] %s2767_s3  ;;  %4139 = vst [vmem:[#allocation57_spill] sm:$0xff] %v2823_v9 }
  0xa8   :  { %s4137_s2 = sld [smem:[#allocation54_spill]] }
  0xa9   :  { %s2817_s19 = sld [smem:[#allocation6 + $0x2b]]  ;;  %v93_v6 = vpop.permute.xlu1 %92  ;;  %v2888_v5 = vpop.permute.xlu0 %83 }
  0xaa   :  { %s2827_s18 = sld [smem:[#allocation6 + $0x34]] }
  0xab   :  { %s2833_s16 = sld [smem:[#allocation6 + $0x3d]] }
  0xac   :  { %s2839_s30 = sld [smem:[#allocation6 + $0x46]] }
  0xad   :  { %s2845_s4 = sld [smem:[#allocation6 + $0x8]]  ;;  %v95_v43 = vpop.permute.xlu1 %94 }
  0xae   :  { %s2851_s22 = sld [smem:[#allocation6 + $0x11]]  ;;  %v97_v54 = vsel %vm96_vm0, %v93_v6, %v95_v43  ;;  %v98_v2 = vsel %vm96_vm0, %v95_v43, %v93_v6 }
  0xaf   :  { %s2859_s1 = sld [smem:[#allocation6 + $0x1a]]  ;;  %v257_v44 = vmul.f32 %v256_v14, %v97_v54  ;;  %v258_v48 = vmul.f32 %v256_v14, %v98_v2  ;;  %v528_v1 = vmul.f32 %v527_v15, %v97_v54  ;;  %v529_v40 = vmul.f32 %v527_v15, %v98_v2 }
  0xb0   :  { %s2870_s3 = sld [smem:[#allocation6 + $0x23]]  ;;  %v796_v6 = vmul.f32 %v795_v16, %v97_v54  ;;  %v797_v43 = vmul.f32 %v795_v16, %v98_v2  ;;  %v1064_v49 = vmul.f32 %v1063_v17, %v97_v54  ;;  %v1065_v14 = vmul.f32 %v1063_v17, %v98_v2 }
  0xb1   :  { %v261_v58 = vcombine.low %v257_v44, %v258_v48  ;;  %v532_v0 = vcombine.low %v528_v1, %v529_v40  ;;  %v1332_v15 = vmul.f32 %v1331_v18, %v97_v54  ;;  %v1333_v38 = vmul.f32 %v1331_v18, %v98_v2  ;;  %v100_v18 = vpop.permute.xlu0 %99  ;;  %s4165_s0 = sld [smem:[#allocation31_spill]] }
  0xb2   :  { %v800_v12 = vcombine.low %v796_v6, %v797_v43  ;;  %v1068_v11 = vcombine.low %v1064_v49, %v1065_v14  ;;  %v1600_v10 = vmul.f32 %v1599_v19, %v97_v54  ;;  %v1601_v16 = vmul.f32 %v1599_v19, %v98_v2  ;;  %s4171_s23 = sld [smem:[#allocation34_spill]] }
  0xb3   :  { %v2891_v17 = vrot.slane %v261_v58, %v2607_v8  ;;  %v2894_v40 = vrot.slane %v532_v0, %v2607_v8  ;;  %v1336_v1 = vcombine.low %v1332_v15, %v1333_v38  ;;  %v1868_v48 = vmul.f32 %v1867_v20, %v97_v54  ;;  %v102_v15 = vpop.permute.xlu1 %101  ;;  %s4173_s8 = sld [smem:[#allocation35_spill]] }
  0xb4   :  { %v1869_v49 = vmul.f32 %v1867_v20, %v98_v2  ;;  %v2904_v19 = vrot.slane %v800_v12, %v2607_v8  ;;  %v2907_v43 = vrot.slane %v1068_v11, %v2607_v8  ;;  %v1604_v0 = vcombine.low %v1600_v10, %v1601_v16  ;;  %s4236_s9 = sld [smem:[#allocation50_spill]] }
  0xb5   :  { %v269_v38 = vcombine.high %v2891_v17, %v2891_v17  ;;  %v540_v12 = vcombine.high %v2894_v40, %v2894_v40  ;;  %v2924_v10 = vrot.slane %v1336_v1, %v2607_v8  ;;  %v2136_v44 = vmul.f32 %v2135_v21, %v97_v54  ;;  %s4251_s12 = sld [smem:[#allocation52_spill]] }
  0xb6   :  { %v1872_v16 = vcombine.low %v1868_v48, %v1869_v49  ;;  %v808_v50 = vcombine.high %v2904_v19, %v2904_v19  ;;  %v1076_v6 = vcombine.high %v2907_v43, %v2907_v43  ;;  %v2937_v1 = vrot.slane %v1604_v0, %v2607_v8  ;;  %s4261_s5 = sld [smem:[#allocation53_spill]] }
  0xb7   :  { %v2137_v54 = vmul.f32 %v2135_v21, %v98_v2  ;;  %v104_v48 = vsel %vm103_vm1, %v100_v18, %v102_v15  ;;  %v105_v49 = vsel %vm103_vm1, %v102_v15, %v100_v18  ;;  %v2946_v14 = vrot.slane %v269_v38, %v2607_v8 }
  0xb8   :  { %4150 = vst [vmem:[#allocation58_spill] sm:$0xff] %v2937_v1  ;;  %v2949_v58 = vrot.slane %v540_v12, %v2607_v8  ;;  %v289_v0 = vmul.f32 %v288_v22, %v104_v48  ;;  %v290_v11 = vmul.f32 %v288_v22, %v105_v49  ;;  %v1344_v2 = vcombine.high %v2924_v10, %v2924_v10 }
  0xb9   :  { %v2958_v21 = vrot.slane %v1872_v16, %v2607_v8  ;;  %v2140_v18 = vcombine.low %v2136_v44, %v2137_v54  ;;  %v560_v15 = vmul.f32 %v559_v23, %v104_v48  ;;  %v561_v12 = vmul.f32 %v559_v23, %v105_v49 }
  0xba   :  { %v293_v38 = vcombine.low %v289_v0, %v290_v11  ;;  %v828_v20 = vmul.f32 %v827_v24, %v104_v48  ;;  %v829_v22 = vmul.f32 %v827_v24, %v105_v49  ;;  %v1612_v46 = vcombine.high %v2937_v1, %v2937_v1 }
  0xbb   :  { %4153 = vst [vmem:[#allocation59_spill] sm:$0xff] %v2958_v21  ;;  %v2972_v45 = vrot.slane %v2140_v18, %v2607_v8  ;;  %v1096_v44 = vmul.f32 %v1095_v25, %v104_v48  ;;  %v1097_v16 = vmul.f32 %v1095_v25, %v105_v49  ;;  %v564_v11 = vcombine.low %v560_v15, %v561_v12 }
  0xbc   :  { %v2979_v54 = vrot.slane %v293_v38, %v2607_v8  ;;  %v832_v0 = vcombine.low %v828_v20, %v829_v22  ;;  %v1364_v23 = vmul.f32 %v1363_v26, %v104_v48  ;;  %v2984_v24 = vrot.slane %v808_v50, %v2607_v8 }
  0xbd   :  { %4154 = vst [vmem:[#allocation60_spill] sm:$0xff] %v2972_v45  ;;  %v1880_v42 = vcombine.high %v2958_v21, %v2958_v21  ;;  %v1100_v18 = vcombine.low %v1096_v44, %v1097_v16  ;;  %v1365_v41 = vmul.f32 %v1363_v26, %v105_v49  ;;  %v2991_v39 = vrot.slane %v1076_v6, %v2607_v8 }
  0xbe   :  { %v2148_v20 = vcombine.high %v2972_v45, %v2972_v45  ;;  %v301_v15 = vcombine.high %v2979_v54, %v2979_v54  ;;  %v3002_v38 = vrot.slane %v564_v11, %v2607_v8  ;;  %v3005_v26 = vrot.slane %v832_v0, %v2607_v8  ;;  %v109_v0 = vpop.permute.xlu1 %108 }
  0xbf   :  { %v1368_v6 = vcombine.low %v1364_v23, %v1365_v41  ;;  %v3008_v12 = vrot.slane %v1344_v2, %v2607_v8  ;;  %v3011_v22 = vrot.slane %v1612_v46, %v2607_v8  ;;  %v1632_v16 = vmul.f32 %v1631_v27, %v104_v48  ;;  %v107_v41 = vpop.permute.xlu0 %106 }
  0xc0   :  { %v3018_v11 = vrot.slane %v1880_v42, %v2607_v8  ;;  %v3025_v46 = vrot.slane %v1100_v18, %v2607_v8  ;;  %v3028_v23 = vrot.slane %v2148_v20, %v2607_v8  ;;  %v3031_v44 = vrot.slane %v301_v15, %v2607_v8 }
  0xc1   :  { %4157 = vst [vmem:[#allocation61_spill] sm:$0xff] %v3011_v22  ;;  %v1633_v42 = vmul.f32 %v1631_v27, %v105_v49  ;;  %v1900_v50 = vmul.f32 %v1899_v28, %v104_v48  ;;  %v572_v2 = vcombine.high %v3002_v38, %v3002_v38  ;;  %v840_v18 = vcombine.high %v3005_v26, %v3005_v26 }
  0xc2   :  { %4159 = vst [vmem:[#allocation62_spill] sm:$0xff] %v3018_v11  ;;  %4160 = vst [vmem:[#allocation63_spill] sm:$0xff] %v3028_v23  ;;  %v3042_v20 = vrot.slane %v1368_v6, %v2607_v8  ;;  %v1901_v15 = vmul.f32 %v1899_v28, %v105_v49  ;;  %v2168_v27 = vmul.f32 %v2167_v29, %v104_v48  ;;  %v4177_v45 = vstv %s4116_s27  ;;  %s4190_s27 = sld [smem:[#allocation39_spill]] }
  0xc3   :  { %v1636_v25 = vcombine.low %v1632_v16, %v1633_v42  ;;  %v2169_v37 = vmul.f32 %v2167_v29, %v105_v49  ;;  %v111_v36 = vsel %vm110_vm2, %v107_v41, %v109_v0  ;;  %v1108_v35 = vcombine.high %v3025_v46, %v3025_v46 }
  0xc4   :  { %4162 = vst [vmem:[#allocation64_spill] sm:$0xff] %v3042_v20  ;;  %v1904_v34 = vcombine.low %v1900_v50, %v1901_v15  ;;  %v112_v6 = vsel %vm110_vm2, %v109_v0, %v107_v41  ;;  %v321_v33 = vmul.f32 %v320_v30, %v111_v36  ;;  %v592_v29 = vmul.f32 %v591_v31, %v111_v36 }
  0xc5   :  { %v3059_v28 = vrot.slane %v1636_v25, %v2607_v8  ;;  %v2172_v16 = vcombine.low %v2168_v27, %v2169_v37  ;;  %v322_v48 = vmul.f32 %v320_v30, %v112_v6  ;;  %v593_v50 = vmul.f32 %v591_v31, %v112_v6 }
  0xc6   :  { %v860_v42 = vmul.f32 %v859_v32, %v111_v36  ;;  %v861_v41 = vmul.f32 %v859_v32, %v112_v6  ;;  %v1376_v30 = vcombine.high %v3042_v20, %v3042_v20  ;;  %v3079_v37 = vrot.slane %v1904_v34, %v2607_v8 }
  0xc7   :  { %4164 = vst [vmem:[#allocation65_spill] sm:$0xff] %v3059_v28  ;;  %v325_v0 = vcombine.low %v321_v33, %v322_v48  ;;  %v1644_v31 = vcombine.high %v3059_v28, %v3059_v28  ;;  %v3086_v32 = vrot.slane %v2172_v16, %v2607_v8  ;;  %v596_v27 = vcombine.low %v592_v29, %v593_v50  ;;  %v86_v28 = vpop.permute.xlu0 %85 }
  0xc8   :  { %4166 = vst [vmem:[#allocation66_spill] sm:$0xff] %v3079_v37  ;;  %v3089_v25 = vrot.slane %v572_v2, %v2607_v8  ;;  %v3092_v49 = vrot.slane %v840_v18, %v2607_v8  ;;  %v3095_v34 = vrot.slane %v1108_v35, %v2607_v8  ;;  %v864_v33 = vcombine.low %v860_v42, %v861_v41 }
  0xc9   :  { %4167 = vst [vmem:[#allocation67_spill] sm:$0xff] %v3086_v32  ;;  %v3100_v15 = vrot.slane %v325_v0, %v2607_v8  ;;  %v3103_v16 = vrot.slane %v596_v27, %v2607_v8  ;;  %v4168_v2 = vstv %s4165_s0  ;;  %v3108_v18 = vrot.slane %v1376_v30, %v2607_v8 }
  0xca   :  { %v1128_v29 = vmul.f32 %v4168_v2, %v111_v36  ;;  %v1912_v50 = vcombine.high %v3079_v37, %v3079_v37  ;;  %v4170_v42 = vmov %v4168_v2  ;;  %v3117_v0 = vrot.slane %v1644_v31, %v2607_v8 }
  0xcb   :  { %4169 = vst [vmem:[#allocation68_spill] sm:$0xff] %v3108_v18  ;;  %v1129_v41 = vmul.f32 %v4170_v42, %v112_v6  ;;  %v2180_v30 = vcombine.high %v3086_v32, %v3086_v32  ;;  %v3126_v35 = vrot.slane %v864_v33, %v2607_v8  ;;  %v4175_v48 = vstv %s4115_s6  ;;  %s4194_s6 = sld [smem:[#allocation40_spill]] }
  0xcc   :  { %4172 = vst [vmem:[#allocation69_spill] sm:$0xff] %v3117_v0  ;;  %v1396_v23 = vmul.f32 %v4175_v48, %v111_v36  ;;  %v4176_v31 = vmov %v4175_v48  ;;  %v333_v27 = vcombine.high %v3100_v15, %v3100_v15  ;;  %v604_v37 = vcombine.high %v3103_v16, %v3103_v16 }
  0xcd   :  { %4174 = vst [vmem:[#allocation70_spill] sm:$0xff] %v3126_v35  ;;  %v1132_v42 = vcombine.low %v1128_v29, %v1129_v41  ;;  %v1397_v0 = vmul.f32 %v4176_v31, %v112_v6  ;;  %v1664_v9 = vmul.f32 %v4177_v45, %v111_v36  ;;  %v4178_v11 = vmov %v4177_v45 }
  0xce   :  { %v1665_v2 = vmul.f32 %v4178_v11, %v112_v6  ;;  %v4180_v41 = vstv %s4171_s23  ;;  %v4182_v21 = vstv %s4173_s8  ;;  %v3154_v45 = vsel %vm89_vm3, %v2888_v5, %v86_v28 }
  0xcf   :  { %v3141_v33 = vrot.slane %v1132_v42, %v2607_v8  ;;  %v1400_v29 = vcombine.low %v1396_v23, %v1397_v0  ;;  %v1932_v48 = vmul.f32 %v4180_v41, %v111_v36  ;;  %v4181_v32 = vmov %v4180_v41 }
  0xd0   :  { %v1933_v31 = vmul.f32 %v4181_v32, %v112_v6  ;;  %v1668_v18 = vcombine.low %v1664_v9, %v1665_v2  ;;  %v2200_v22 = vmul.f32 %v4182_v21, %v111_v36  ;;  %v4183_v20 = vmov %v4182_v21 }
  0xd1   :  { %4179 = vst [vmem:[#allocation71_spill] sm:$0xff] %v3141_v33  ;;  %v2201_v1 = vmul.f32 %v4183_v20, %v112_v6  ;;  %v3157_v11 = vrot.slane %v1912_v50, %v2607_v8  ;;  %v3160_v23 = vrot.slane %v2180_v30, %v2607_v8  ;;  %v872_v32 = vcombine.high %v3126_v35, %v3126_v35 }
  0xd2   :  { %v1140_v36 = vcombine.high %v3141_v33, %v3141_v33  ;;  %v3167_v9 = vrot.slane %v1400_v29, %v2607_v8  ;;  %v1936_v21 = vcombine.low %v1932_v48, %v1933_v31  ;;  %v3172_v20 = vsel %vm89_vm3, %v86_v28, %v2888_v5 }
  0xd3   :  { %4184 = vst [vmem:[#allocation72_spill] sm:$0xff] %v3157_v11  ;;  %4185 = vst [vmem:[#allocation73_spill] sm:$0xff] %v3160_v23  ;;  %v4187_v6 = vstv %s4118_s10  ;;  %v3184_v42 = vrot.slane %v1668_v18, %v2607_v8  ;;  %v3187_v5 = vrot.slane %v333_v27, %v2607_v8  ;;  %v3190_v28 = vrot.slane %v604_v37, %v2607_v8  ;;  %s4204_s10 = sld [smem:[#allocation41_spill]] }
  0xd4   :  { %4186 = vst [vmem:[#allocation74_spill] sm:$0xff] %v3167_v9  ;;  %v225_v50 = vmul.f32 %v4187_v6, %v3154_v45  ;;  %v2204_v29 = vcombine.low %v2200_v22, %v2201_v1  ;;  %v4189_v41 = vmov %v4187_v6  ;;  %v3196_v31 = vrot.slane %v872_v32, %v2607_v8 }
  0xd5   :  { %4188 = vst [vmem:[#allocation75_spill] sm:$0xff] %v3190_v28  ;;  %v226_v48 = vmul.f32 %v4189_v41, %v3172_v20  ;;  %v3201_v6 = vrot.slane %v1140_v36, %v2607_v8  ;;  %v4193_v27 = vstv %s4119_s13  ;;  %v1408_v1 = vcombine.high %v3167_v9, %v3167_v9  ;;  %s4206_s13 = sld [smem:[#allocation47_spill]] }
  0xd6   :  { %4191 = vst [vmem:[#allocation76_spill] sm:$0xff] %v3196_v31  ;;  %v496_v37 = vmul.f32 %v4193_v27, %v3154_v45  ;;  %v3211_v32 = vrot.slane %v1936_v21, %v2607_v8  ;;  %v1676_v18 = vcombine.high %v3184_v42, %v3184_v42  ;;  %v4196_v36 = vmov %v4193_v27 }
  0xd7   :  { %4192 = vst [vmem:[#allocation77_spill] sm:$0xff] %v3201_v6  ;;  %v229_v41 = vcombine.low %v225_v50, %v226_v48  ;;  %v497_v2 = vmul.f32 %v4196_v36, %v3172_v20  ;;  %v4197_v30 = vstv %s4120_s14  ;;  %v3225_v11 = vrot.slane %v2204_v29, %v2607_v8  ;;  %s4210_s14 = sld [smem:[#allocation49_spill]] }
  0xd8   :  { %4195 = vst [vmem:[#allocation78_spill] sm:$0xff] %v3211_v32  ;;  %v764_v27 = vmul.f32 %v4197_v30, %v3154_v45  ;;  %v4198_v0 = vmov %v4197_v30  ;;  %v4200_v21 = vstv %s4190_s27  ;;  %v4202_v36 = vstv %s4194_s6 }
  0xd9   :  { %v765_v23 = vmul.f32 %v4198_v0, %v3172_v20  ;;  %4199 = vst [vmem:[#allocation79_spill] sm:$0xff] %v3225_v11  ;;  %v236_v22 = vrot.slane %v229_v41, %v2607_v8  ;;  %v1032_v50 = vmul.f32 %v4200_v21, %v3154_v45  ;;  %v4201_v48 = vmov %v4200_v21 }
  0xda   :  { %v1033_v9 = vmul.f32 %v4201_v48, %v3172_v20  ;;  %v500_v6 = vcombine.low %v496_v37, %v497_v2  ;;  %v1300_v31 = vmul.f32 %v4202_v36, %v3154_v45  ;;  %v4203_v30 = vmov %v4202_v36 }
  0xdb   :  { %v768_v33 = vcombine.low %v764_v27, %v765_v23  ;;  %v1301_v35 = vmul.f32 %v4203_v30, %v3172_v20  ;;  %v237_v29 = vcombine.high %v236_v22, %v236_v22  ;;  %v244_v41 = vrot.slane %v236_v22, %v2607_v8 }
  0xdc   :  { %v1036_v28 = vcombine.low %v1032_v50, %v1033_v9  ;;  %v3244_v21 = vrot.slane %v1408_v1, %v2607_v8  ;;  %v1944_v2 = vcombine.high %v3211_v32, %v3211_v32  ;;  %v507_v23 = vrot.slane %v500_v6, %v2607_v8 }
  0xdd   :  { %v775_v37 = vrot.slane %v768_v33, %v2607_v8  ;;  %v3251_v27 = vrot.slane %v1676_v18, %v2607_v8  ;;  %v1304_v22 = vcombine.low %v1300_v31, %v1301_v35  ;;  %v2212_v1 = vcombine.high %v3225_v11, %v3225_v11 }
  0xde   :  { %v1043_v9 = vrot.slane %v1036_v28, %v2607_v8  ;;  %v251_v50 = vrot.slane %v237_v29, %v2607_v8  ;;  %v508_v36 = vcombine.high %v507_v23, %v507_v23  ;;  %v254_v18 = vadd.f32 %v244_v41, %v2762_v47 }
  0xdf   :  { %4205 = vst [vmem:[#allocation80_spill] sm:$0xff] %v3251_v27  ;;  %v776_v6 = vcombine.high %v775_v37, %v775_v37  ;;  %v515_v30 = vrot.slane %v507_v23, %v2607_v8  ;;  %v783_v48 = vrot.slane %v775_v37, %v2607_v8  ;;  %v4207_v28 = vstv %s4204_s10 }
  0xe0   :  { %v1044_v0 = vcombine.high %v1043_v9, %v1043_v9  ;;  %v1051_v35 = vrot.slane %v1043_v9, %v2607_v8  ;;  %v1568_v31 = vmul.f32 %v4207_v28, %v3154_v45  ;;  %v4208_v29 = vmov %v4207_v28 }
  0xe1   :  { %v1569_v32 = vmul.f32 %v4208_v29, %v3172_v20  ;;  %v3272_v27 = vrot.slane %v1944_v2, %v2607_v8  ;;  %v522_v33 = vrot.slane %v508_v36, %v2607_v8  ;;  %v790_v47 = vrot.slane %v776_v6, %v2607_v8 }
  0xe2   :  { %v1311_v41 = vrot.slane %v1304_v22, %v2607_v8  ;;  %v3278_v23 = vrot.slane %v2212_v1, %v2607_v8  ;;  %v255_v37 = vadd.f32 %v251_v50, %v2770_v51  ;;  %v1058_v9 = vrot.slane %v1044_v0, %v2607_v8 }
  0xe3   :  { %4209 = vst [vmem:[#allocation81_spill] sm:$0xff] %v3272_v27  ;;  %v4212_v28 = vstv %s4206_s13  ;;  %v4213_v2 = vrot.slane %v2891_v17, %v2607_v8  ;;  %v525_v6 = vadd.f32 %v515_v30, %v2773_v52  ;;  %v793_v1 = vadd.f32 %v783_v48, %v2782_v55 }
  0xe4   :  { %4211 = vst [vmem:[#allocation82_spill] sm:$0xff] %v3278_v23  ;;  %v1836_v29 = vmul.f32 %v4212_v28, %v3154_v45  ;;  %v1312_v11 = vcombine.high %v1311_v41, %v1311_v41  ;;  %v1319_v22 = vrot.slane %v1311_v41, %v2607_v8  ;;  %v1061_v23 = vadd.f32 %v1051_v35, %v2788_v57 }
  0xe5   :  { %v286_v36 = vadd.f32 %v4213_v2, %v254_v18  ;;  %v1572_v51 = vcombine.low %v1568_v31, %v1569_v32  ;;  %v4214_v0 = vmov %v4212_v28  ;;  %v526_v28 = vadd.f32 %v522_v33, %v2776_v53 }
  0xe6   :  { %v1837_v50 = vmul.f32 %v4214_v0, %v3172_v20  ;;  %v794_v27 = vadd.f32 %v790_v47, %v2785_v56  ;;  %v1326_v17 = vrot.slane %v1312_v11, %v2607_v8  ;;  %v4215_v18 = vstv %s4210_s14 }
  0xe7   :  { %v2104_v52 = vmul.f32 %v4215_v18, %v3154_v45  ;;  %v1062_v30 = vadd.f32 %v1058_v9, %v2794_v59  ;;  %v1579_v41 = vrot.slane %v1572_v51, %v2607_v8  ;;  %v4216_v57 = vmov %v4215_v18 }
  0xe8   :  { %v1840_v55 = vcombine.low %v1836_v29, %v1837_v50  ;;  %v2105_v32 = vmul.f32 %v4216_v57, %v3172_v20  ;;  %v287_v48 = vadd.f32 %v2946_v14, %v255_v37  ;;  %v4217_v53 = vrot.slane %v2894_v40, %v2607_v8 }
  0xe9   :  { %v1329_v56 = vadd.f32 %v1319_v22, %v2797_v60  ;;  %v1330_v11 = vadd.f32 %v1326_v17, %v2800_v61  ;;  %v1580_v35 = vcombine.high %v1579_v41, %v1579_v41  ;;  %v1587_v45 = vrot.slane %v1579_v41, %v2607_v8  ;;  %v4228_v41 = vld [vmem:[#allocation64_spill] sm:$0xff] }
  0xea   :  { %v557_v33 = vadd.f32 %v4217_v53, %v525_v6  ;;  %v1847_v59 = vrot.slane %v1840_v55, %v2607_v8  ;;  %v2108_v31 = vcombine.low %v2104_v52, %v2105_v32  ;;  %v558_v47 = vadd.f32 %v2949_v58, %v526_v28  ;;  %v4225_v52 = vld [vmem:[#allocation58_spill] sm:$0xff]  ;;  %v4231_v32 = vld [vmem:[#allocation59_spill] sm:$0xff]  ;;  %v116_v53 = vpop.permute.xlu1 %115 }
  0xeb   :  { %v4218_v20 = vrot.slane %v2904_v19, %v2607_v8  ;;  %v826_v37 = vadd.f32 %v2984_v24, %v794_v27  ;;  %v4219_v40 = vrot.slane %v2907_v43, %v2607_v8  ;;  %v1094_v61 = vadd.f32 %v2991_v39, %v1062_v30 }
  0xec   :  { %v1594_v9 = vrot.slane %v1580_v35, %v2607_v8  ;;  %v1848_v29 = vcombine.high %v1847_v59, %v1847_v59  ;;  %v1855_v2 = vrot.slane %v1847_v59, %v2607_v8  ;;  %v4220_v58 = vrot.slane %v2924_v10, %v2607_v8  ;;  %v4235_v35 = vld [vmem:[#allocation62_spill] sm:$0xff]  ;;  %v4237_v59 = vld [vmem:[#allocation75_spill] sm:$0xff] }
  0xed   :  { %v825_v14 = vadd.f32 %v4218_v20, %v793_v1  ;;  %v1093_v60 = vadd.f32 %v4219_v40, %v1061_v23  ;;  %v2115_v6 = vrot.slane %v2108_v31, %v2607_v8  ;;  %v4221_v24 = vrot.slane %v2979_v54, %v2607_v8  ;;  %v4241_v40 = vld [vmem:[#allocation57_spill] sm:$0xff] }
  0xee   :  { %v1361_v19 = vadd.f32 %v4220_v58, %v1329_v56  ;;  %v319_v27 = vadd.f32 %v3031_v44, %v287_v48  ;;  %v1362_v23 = vadd.f32 %v3008_v12, %v1330_v11  ;;  %v1597_v39 = vadd.f32 %v1587_v45, %v2803_v62  ;;  %v4234_v56 = vld [vmem:[#allocation68_spill] sm:$0xff] }
  0xef   :  { %v318_v43 = vadd.f32 %v4221_v24, %v286_v36  ;;  %v1862_v22 = vrot.slane %v1848_v29, %v2607_v8  ;;  %v4222_v1 = vrot.slane %v3002_v38, %v2607_v8  ;;  %v1598_v10 = vadd.f32 %v1594_v9, %v2808_v63 }
  0xf0   :  { %v1865_v0 = vadd.f32 %v1855_v2, %v2811_v3  ;;  %v2116_v50 = vcombine.high %v2115_v6, %v2115_v6  ;;  %v2123_v54 = vrot.slane %v2115_v6, %v2607_v8  ;;  %v590_v44 = vadd.f32 %v3089_v25, %v558_v47  ;;  %v4238_v47 = vld [vmem:[#allocation70_spill] sm:$0xff]  ;;  %v4244_v2 = vld [vmem:[#allocation71_spill] sm:$0xff]  ;;  %v4246_v6 = vld [vmem:[#allocation77_spill] sm:$0xff] }
  0xf1   :  { %v589_v51 = vadd.f32 %v4222_v1, %v557_v33  ;;  %v1866_v36 = vadd.f32 %v1862_v22, %v2814_v4  ;;  %v4223_v62 = vrot.slane %v3005_v26, %v2607_v8  ;;  %v858_v28 = vadd.f32 %v3092_v49, %v826_v37  ;;  %v4240_v37 = vld [vmem:[#allocation76_spill] sm:$0xff] }
  0xf2   :  { %v2130_v38 = vrot.slane %v2116_v50, %v2607_v8  ;;  %v2133_v17 = vadd.f32 %v2123_v54, %v2820_v7  ;;  %v4224_v63 = vrot.slane %v3025_v46, %v2607_v8  ;;  %v1126_v18 = vadd.f32 %v3095_v34, %v1094_v61  ;;  %v4230_v46 = vld [vmem:[#allocation61_spill] sm:$0xff]  ;;  %v4242_v61 = vld [vmem:[#allocation60_spill] sm:$0xff] }
  0xf3   :  { %v857_v12 = vadd.f32 %v4223_v62, %v825_v14  ;;  %v4226_v4 = vrot.slane %v4225_v52, %v2607_v8  ;;  %v4227_v26 = vrot.slane %v3100_v15, %v2607_v8  ;;  %v3364_v49 = vadd.f32 %v3187_v5, %v319_v27  ;;  %v114_v5 = vpop.permute.xlu0 %113  ;;  %v4252_v50 = vld [vmem:[#allocation69_spill] sm:$0xff] }
  0xf4   :  { %v1125_v3 = vadd.f32 %v4224_v63, %v1093_v60  ;;  %v4229_v7 = vrot.slane %v4228_v41, %v2607_v8  ;;  %v1630_v57 = vadd.f32 %v4230_v46, %v1598_v10  ;;  %v4232_v34 = vrot.slane %v4231_v32, %v2607_v8 }
  0xf5   :  { %v1629_v25 = vadd.f32 %v4226_v4, %v1597_v39  ;;  %v3361_v30 = vadd.f32 %v4227_v26, %v318_v43  ;;  %v4233_v33 = vrot.slane %v3103_v16, %v2607_v8  ;;  %v1394_v11 = vadd.f32 %v4234_v56, %v1362_v23  ;;  %v4247_v43 = vld [vmem:[#allocation74_spill] sm:$0xff]  ;;  %v4249_v39 = vld [vmem:[#allocation65_spill] sm:$0xff]  ;;  %v4260_v26 = vld [vmem:[#allocation63_spill] sm:$0xff] }
  0xf6   :  { %v1393_v55 = vadd.f32 %v4229_v7, %v1361_v19  ;;  %v1897_v48 = vadd.f32 %v4232_v34, %v1865_v0  ;;  %v1898_v45 = vadd.f32 %v4235_v35, %v1866_v36  ;;  %v3381_v31 = vadd.f32 %v4237_v59, %v590_v44  ;;  %v4253_v36 = vld [vmem:[#allocation66_spill] sm:$0xff]  ;;  %v4268_v59 = vld [vmem:[#allocation72_spill] sm:$0xff] }
  0xf7   :  { %v3376_v15 = vadd.f32 %v4233_v33, %v589_v51  ;;  %v4239_v20 = vrot.slane %v4238_v47, %v2607_v8  ;;  %v3389_v16 = vadd.f32 %v4240_v37, %v858_v28  ;;  %v2134_v60 = vadd.f32 %v2130_v38, %v4241_v40 }
  0xf8   :  { %v4243_v9 = vrot.slane %v4242_v61, %v2607_v8  ;;  %v4245_v58 = vrot.slane %v4244_v2, %v2607_v8  ;;  %v3401_v24 = vadd.f32 %v4246_v6, %v1126_v18  ;;  %v4248_v27 = vrot.slane %v4247_v43, %v2607_v8  ;;  %v4271_v6 = vld [vmem:[#allocation67_spill] sm:$0xff] }
  0xf9   :  { %v3386_v14 = vadd.f32 %v4239_v20, %v857_v12  ;;  %v4250_v22 = vrot.slane %v4249_v39, %v2607_v8  ;;  %v118_v51 = vsel %vm117_vm4, %v114_v5, %v116_v53  ;;  %v119_v10 = vsel %vm117_vm4, %v116_v53, %v114_v5 }
  0xfa   :  { %v2165_v29 = vadd.f32 %v4243_v9, %v2133_v17  ;;  %v3398_v19 = vadd.f32 %v4245_v58, %v1125_v3  ;;  %v3406_v23 = vadd.f32 %v4248_v27, %v1393_v55  ;;  %v3416_v0 = vadd.f32 %v3244_v21, %v1394_v11  ;;  %v4273_v27 = vld [vmem:[#allocation73_spill] sm:$0xff] }
  0xfb   :  { %v1661_v1 = vadd.f32 %v4250_v22, %v1629_v25  ;;  %v1662_v54 = vadd.f32 %v4252_v50, %v1630_v57  ;;  %v4254_v44 = vrot.slane %v4253_v36, %v2607_v8  ;;  %v4255_v12 = vstv %s4236_s9  ;;  %v4275_v36 = vld [vmem:[#allocation78_spill] sm:$0xff] }
  0xfc   :  { %v353_v28 = vmul.f32 %v4255_v12, %v118_v51  ;;  %v4256_v38 = vmov %v4255_v12  ;;  %v4257_v63 = vstv %s4135_s21  ;;  %v4259_v4 = vstv %s2696_s28  ;;  %s4280_s28 = sld [smem:[#allocation55_spill]] }
  0xfd   :  { %v1929_v62 = vadd.f32 %v4254_v44, %v1897_v48  ;;  %v354_v17 = vmul.f32 %v4256_v38, %v119_v10  ;;  %v624_v3 = vmul.f32 %v4257_v63, %v118_v51  ;;  %v4258_v18 = vmov %v4257_v63  ;;  %s4290_s21 = sld [smem:[#allocation32_spill]] }
  0xfe   :  { %v625_v52 = vmul.f32 %v4258_v18, %v119_v10  ;;  %v892_v25 = vmul.f32 %v4259_v4, %v118_v51  ;;  %v2166_v21 = vadd.f32 %v4260_v26, %v2134_v60  ;;  %v4262_v41 = vmov %v4259_v4 }
  0xff   :  { %v893_v7 = vmul.f32 %v4262_v41, %v119_v10  ;;  %v4263_v55 = vstv %s2698_s29  ;;  %v357_v34 = vcombine.low %v353_v28, %v354_v17  ;;  %v4265_v53 = vstv %s4251_s12  ;;  %v4277_v17 = vld [vmem:[#allocation81_spill] sm:$0xff]  ;;  %v4281_v41 = vld [vmem:[#allocation79_spill] sm:$0xff]  ;;  %s4285_s29 = sld [smem:[#allocation56_spill]] }
 0x100   :  { %v1160_v46 = vmul.f32 %v4263_v55, %v118_v51  ;;  %v4264_v57 = vmov %v4263_v55  ;;  %v628_v48 = vcombine.low %v624_v3, %v625_v52  ;;  %v1428_v33 = vmul.f32 %v4265_v53, %v118_v51  ;;  %v4283_v55 = vld [vmem:[#allocation82_spill] sm:$0xff] }
 0x101   :  { %v1161_v32 = vmul.f32 %v4264_v57, %v119_v10  ;;  %v4266_v56 = vmov %v4265_v53  ;;  %v4267_v5 = vrot.slane %v3184_v42, %v2607_v8  ;;  %v1930_v47 = vadd.f32 %v4268_v59, %v1898_v45 }
 0x102   :  { %v1429_v11 = vmul.f32 %v4266_v56, %v119_v10  ;;  %v896_v20 = vcombine.low %v892_v25, %v893_v7  ;;  %v364_v40 = vrot.slane %v357_v34, %v2607_v8  ;;  %v635_v60 = vrot.slane %v628_v48, %v2607_v8  ;;  %v123_v56 = vpop.permute.xlu1 %122 }
 0x103   :  { %v3447_v35 = vadd.f32 %v4267_v5, %v1661_v1  ;;  %v1164_v37 = vcombine.low %v1160_v46, %v1161_v32  ;;  %v4269_v61 = vstv %s4261_s5  ;;  %v4272_v43 = vrot.slane %v4271_v6, %v2607_v8  ;;  %v4274_v1 = vld [vmem:[#allocation80_spill] sm:$0xff] }
 0x104   :  { %v1696_v9 = vmul.f32 %v4269_v61, %v118_v51  ;;  %v4270_v2 = vmov %v4269_v61  ;;  %v2198_v39 = vadd.f32 %v4273_v27, %v2166_v21  ;;  %v903_v45 = vrot.slane %v896_v20, %v2607_v8 }
 0x105   :  { %v1697_v58 = vmul.f32 %v4270_v2, %v119_v10  ;;  %v2197_v42 = vadd.f32 %v4272_v43, %v2165_v29  ;;  %v1171_v22 = vrot.slane %v1164_v37, %v2607_v8  ;;  %v3463_v50 = vadd.f32 %v4274_v1, %v1662_v54 }
 0x106   :  { %v4276_v44 = vrot.slane %v4275_v36, %v2607_v8  ;;  %v365_v28 = vcombine.high %v364_v40, %v364_v40  ;;  %v1432_v38 = vcombine.low %v1428_v33, %v1429_v11  ;;  %v3471_v63 = vadd.f32 %v4277_v17, %v1930_v47  ;;  %v121_v11 = vpop.permute.xlu0 %120 }
 0x107   :  { %v636_v29 = vcombine.high %v635_v60, %v635_v60  ;;  %v4278_v3 = vstv %s4137_s2  ;;  %v372_v25 = vrot.slane %v364_v40, %v2607_v8  ;;  %v904_v26 = vcombine.high %v903_v45, %v903_v45  ;;  %s2568_s2 = smov [#allocation9]  }
 0x108   :  { %v3468_v12 = vadd.f32 %v4276_v44, %v1929_v62  ;;  %v1964_v18 = vmul.f32 %v4278_v3, %v118_v51  ;;  %v4279_v52 = vmov %v4278_v3  ;;  %v1172_v54 = vcombine.high %v1171_v22, %v1171_v22  ;;  %s2373_s26 = sshll.u32 %s2568_s2, 4  ;;  %s2374_s26 = int_to_ptr.vmem [resolvable:$true] %s2373_s26 }
 0x109   :  { %v1965_v4 = vmul.f32 %v4279_v52, %v119_v10  ;;  %v1700_v21 = vcombine.low %v1696_v9, %v1697_v58  ;;  %v4282_v62 = vrot.slane %v4281_v41, %v2607_v8  ;;  %v3484_v46 = vadd.f32 %v4283_v55, %v2198_v39  ;;  %s2526_s0 = scalar_lea.vmem %s2374_s26, 512  ;;  %p2531_p2 = scmp.lt.s32.totalorder %s2374_s26, %s2374_s26 }
 0x10a   :  { %v643_v57 = vrot.slane %v635_v60, %v2607_v8  ;;  %v911_v32 = vrot.slane %v903_v45, %v2607_v8  ;;  %v379_v34 = vrot.slane %v365_v28, %v2607_v8  ;;  %v3490_v48 = vadd.f32 %v372_v25, %v3361_v30  ;;  %p2527_p1 = scmp.ne.s32.totalorder %s2374_s26, %s2526_s0  ;;  %p2532_p3 = scmp.lt.s32.totalorder %s2526_s0, %s2526_s0 }
 0x10b   :  { %v3481_v7 = vadd.f32 %v4282_v62, %v2197_v42  ;;  %v1179_v53 = vrot.slane %v1171_v22, %v2607_v8  ;;  %v1439_v33 = vrot.slane %v1432_v38, %v2607_v8  ;;  %v650_v5 = vrot.slane %v636_v29, %v2607_v8 }
 0x10c   :  { %v3496_v59 = vadd.f32 %v643_v57, %v3376_v15  ;;  %v1968_v47 = vcombine.low %v1964_v18, %v1965_v4  ;;  %v4284_v20 = vstv %s4280_s28  ;;  %v918_v40 = vrot.slane %v904_v26, %v2607_v8  ;;  %p2533_p4 = por %p2532_p3, %p2531_p2 }
 0x10d   :  { %v2232_v37 = vmul.f32 %v4284_v20, %v118_v51  ;;  %v3502_v30 = vadd.f32 %v911_v32, %v3386_v14  ;;  %v1186_v60 = vrot.slane %v1172_v54, %v2607_v8  ;;  %v1707_v61 = vrot.slane %v1700_v21, %v2607_v8 }
 0x10e   :  { %v1440_v9 = vcombine.high %v1439_v33, %v1439_v33  ;;  %v4286_v2 = vmov %v4284_v20  ;;  %v3510_v15 = vsel %vm124_vm5, %v121_v11, %v123_v56  ;;  %v3514_v51 = vsel %vm124_vm5, %v123_v56, %v121_v11  ;;  %p2534_p5 = pnand %p2533_p4, %p2527_p1 }
 0x10f   :  { %v2233_v58 = vmul.f32 %v4286_v2, %v119_v10  ;;  %v3517_v14 = vadd.f32 %v379_v34, %v3364_v49  ;;  %v3520_v6 = vadd.f32 %v650_v5, %v3381_v31  ;;  %v3523_v43 = vadd.f32 %v918_v40, %v3389_v16 }
 0x110   :  { %v3526_v10 = vadd.f32 %v1179_v53, %v3398_v19  ;;  %v3529_v42 = vadd.f32 %v1186_v60, %v3401_v24  ;;  %v1975_v27 = vrot.slane %v1968_v47, %v2607_v8  ;;  %v4287_v49 = vstv %s4285_s29 }
 0x111   :  { %v2236_v39 = vcombine.low %v2232_v37, %v2233_v58  ;;  %v385_v45 = vmul.f32 %v4287_v49, %v3510_v15  ;;  %v1447_v31 = vrot.slane %v1439_v33, %v2607_v8  ;;  %v1708_v22 = vcombine.high %v1707_v61, %v1707_v61 }
 0x112   :  { %v4288_v16 = vmov %v4287_v49  ;;  %v4289_v19 = vstv %s2722_s7  ;;  %v1454_v24 = vrot.slane %v1440_v9, %v2607_v8  ;;  %v1715_v44 = vrot.slane %v1707_v61, %v2607_v8  ;;  %s4298_s7 = sld [smem:[#allocation33_spill]] }
 0x113   :  { %v386_v1 = vmul.f32 %v4288_v16, %v3514_v51  ;;  %v656_v36 = vmul.f32 %v4289_v19, %v3510_v15  ;;  %v2243_v28 = vrot.slane %v2236_v39, %v2607_v8  ;;  %v4291_v38 = vmov %v4289_v19 }
 0x114   :  { %v657_v17 = vmul.f32 %v4291_v38, %v3514_v51  ;;  %v3549_v29 = vadd.f32 %v1447_v31, %v3406_v23  ;;  %v4292_v18 = vstv %s2728_s11  ;;  %v1976_v26 = vcombine.high %v1975_v27, %v1975_v27  ;;  %s4300_s11 = sld [smem:[#allocation36_spill]] }
 0x115   :  { %v389_v3 = vcombine.low %v385_v45, %v386_v1  ;;  %v924_v52 = vmul.f32 %v4292_v18, %v3510_v15  ;;  %v4293_v4 = vmov %v4292_v18  ;;  %v2244_v54 = vcombine.high %v2243_v28, %v2243_v28  ;;  %v128_v18 = vpop.permute.xlu0 %127 }
 0x116   :  { %v925_v25 = vmul.f32 %v4293_v4, %v3514_v51  ;;  %v660_v21 = vcombine.low %v656_v36, %v657_v17  ;;  %v4294_v41 = vstv %s2734_s15  ;;  %v4296_v34 = vstv %s4290_s21  ;;  %s4303_s15 = sld [smem:[#allocation37_spill]] }
 0x117   :  { %v1192_v62 = vmul.f32 %v4294_v41, %v3510_v15  ;;  %v396_v55 = vrot.slane %v389_v3, %v2607_v8  ;;  %v4295_v23 = vmov %v4294_v41  ;;  %v1460_v53 = vmul.f32 %v4296_v34, %v3510_v15  ;;  %v130_v3 = vpop.permute.xlu1 %129 }
 0x118   :  { %v928_v57 = vcombine.low %v924_v52, %v925_v25  ;;  %v1193_v32 = vmul.f32 %v4295_v23, %v3514_v51  ;;  %v1722_v33 = vrot.slane %v1708_v22, %v2607_v8  ;;  %v3570_v56 = vadd.f32 %v1715_v44, %v3447_v35 }
 0x119   :  { %v667_v11 = vrot.slane %v660_v21, %v2607_v8  ;;  %v4297_v5 = vmov %v4296_v34  ;;  %v3577_v20 = vadd.f32 %v1454_v24, %v3416_v0  ;;  %v1983_v37 = vrot.slane %v1975_v27, %v2607_v8 }
 0x11a   :  { %v1461_v47 = vmul.f32 %v4297_v5, %v3514_v51  ;;  %v397_v40 = vcombine.high %v396_v55, %v396_v55  ;;  %v935_v60 = vrot.slane %v928_v57, %v2607_v8  ;;  %v1990_v61 = vrot.slane %v1976_v26, %v2607_v8 }
 0x11b   :  { %v2251_v9 = vrot.slane %v2243_v28, %v2607_v8  ;;  %v1196_v35 = vcombine.low %v1192_v62, %v1193_v32  ;;  %v3584_v58 = vadd.f32 %v1722_v33, %v3463_v50  ;;  %v3587_v39 = vadd.f32 %v1983_v37, %v3468_v12 }
 0x11c   :  { %v1464_v2 = vcombine.low %v1460_v53, %v1461_v47  ;;  %v2258_v0 = vrot.slane %v2244_v54, %v2607_v8  ;;  %v668_v27 = vcombine.high %v667_v11, %v667_v11  ;;  %v3591_v49 = vadd.f32 %v1990_v61, %v3471_v63 }
 0x11d   :  { %v3594_v45 = vadd.f32 %v2251_v9, %v3481_v7  ;;  %v404_v31 = vrot.slane %v396_v55, %v2607_v8  ;;  %v936_v22 = vcombine.high %v935_v60, %v935_v60  ;;  %v411_v12 = vrot.slane %v397_v40, %v2607_v8 }
 0x11e   :  { %v3598_v50 = vadd.f32 %v2258_v0, %v3484_v46  ;;  %v675_v16 = vrot.slane %v667_v11, %v2607_v8  ;;  %v4299_v1 = vstv %s4298_s7  ;;  %v943_v7 = vrot.slane %v935_v60, %v2607_v8 }
 0x11f   :  { %v1728_v19 = vmul.f32 %v4299_v1, %v3510_v15  ;;  %v3606_v63 = vadd.f32 %v404_v31, %v3490_v48  ;;  %v1203_v36 = vrot.slane %v1196_v35, %v2607_v8  ;;  %v1471_v46 = vrot.slane %v1464_v2, %v2607_v8 }
 0x120   :  { %v682_v24 = vrot.slane %v668_v27, %v2607_v8  ;;  %v3613_v44 = vadd.f32 %v675_v16, %v3496_v59  ;;  %v4301_v28 = vmov %v4299_v1  ;;  %v4302_v17 = vstv %s2752_s25  ;;  %s3720_s25 = sld [smem:[#allocation6 + $0x2c]] }
 0x121   :  { %v1729_v38 = vmul.f32 %v4301_v28, %v3514_v51  ;;  %v1996_v48 = vmul.f32 %v4302_v17, %v3510_v15  ;;  %v3622_v52 = vadd.f32 %v411_v12, %v3517_v14  ;;  %v950_v4 = vrot.slane %v936_v22, %v2607_v8 }
 0x122   :  { %v3626_v25 = vadd.f32 %v943_v7, %v3502_v30  ;;  %v4304_v59 = vmov %v4302_v17  ;;  %v3632_v54 = vadd.f32 %v682_v24, %v3520_v6  ;;  %v4305_v41 = vstv %s4300_s11 }
 0x123   :  { %v1997_v26 = vmul.f32 %v4304_v59, %v3514_v51  ;;  %v1732_v21 = vcombine.low %v1728_v19, %v1729_v38  ;;  %v2264_v62 = vmul.f32 %v4305_v41, %v3510_v15  ;;  %v4306_v14 = vmov %v4305_v41 }
 0x124   :  { %v2265_v55 = vmul.f32 %v4306_v14, %v3514_v51  ;;  %v1204_v57 = vcombine.high %v1203_v36, %v1203_v36  ;;  %v1472_v23 = vcombine.high %v1471_v46, %v1471_v46  ;;  %v132_v30 = vsel %vm131_vm6, %v128_v18, %v130_v3 }
 0x125   :  { %v2000_v32 = vcombine.low %v1996_v48, %v1997_v26  ;;  %v1739_v34 = vrot.slane %v1732_v21, %v2607_v8  ;;  %v3645_v6 = vsel %vm131_vm6, %v130_v3, %v128_v18  ;;  %v4307_v33 = vstv %s4303_s15 }
 0x126   :  { %v2268_v53 = vcombine.low %v2264_v62, %v2265_v55  ;;  %v417_v11 = vmul.f32 %v4307_v33, %v132_v30  ;;  %v4308_v51 = vmov %v4307_v33  ;;  %v4309_v47 = vstv %s2779_s17  ;;  %s3725_s17 = sld [smem:[#allocation6 + $0x35]] }
 0x127   :  { %v2007_v15 = vrot.slane %v2000_v32, %v2607_v8  ;;  %v418_v5 = vmul.f32 %v4308_v51, %v3645_v6  ;;  %v688_v37 = vmul.f32 %v4309_v47, %v132_v30  ;;  %v4310_v40 = vmov %v4309_v47 }
 0x128   :  { %v689_v60 = vmul.f32 %v4310_v40, %v3645_v6  ;;  %v3659_v61 = vadd.f32 %v950_v4, %v3523_v43  ;;  %v1211_v9 = vrot.slane %v1203_v36, %v2607_v8  ;;  %v1740_v35 = vcombine.high %v1739_v34, %v1739_v34 }
 0x129   :  { %v2275_v2 = vrot.slane %v2268_v53, %v2607_v8  ;;  %v1218_v0 = vrot.slane %v1204_v57, %v2607_v8  ;;  %v1479_v27 = vrot.slane %v1471_v46, %v2607_v8  ;;  %v2008_v31 = vcombine.high %v2007_v15, %v2007_v15 }
 0x12a   :  { %v421_v22 = vcombine.low %v417_v11, %v418_v5  ;;  %v3666_v12 = vadd.f32 %v1211_v9, %v3526_v10  ;;  %v1486_v16 = vrot.slane %v1472_v23, %v2607_v8  ;;  %v692_v1 = vcombine.low %v688_v37, %v689_v60 }
 0x12b   :  { %v4311_v43 = vstv %s2791_s20  ;;  %v3672_v7 = vadd.f32 %v1218_v0, %v3529_v42  ;;  %v3675_v36 = vadd.f32 %v1479_v27, %v3549_v29  ;;  %v1747_v24 = vrot.slane %v1739_v34, %v2607_v8  ;;  %s3754_s20 = sld [smem:[#allocation7 + $0x2]] }
 0x12c   :  { %v956_v19 = vmul.f32 %v4311_v43, %v132_v30  ;;  %v2276_v46 = vcombine.high %v2275_v2, %v2275_v2  ;;  %v3679_v28 = vadd.f32 %v1486_v16, %v3577_v20  ;;  %v1754_v10 = vrot.slane %v1740_v35, %v2607_v8 }
 0x12d   :  { %v2015_v38 = vrot.slane %v2007_v15, %v2607_v8  ;;  %v4312_v17 = vmov %v4311_v43  ;;  %v3687_v42 = vadd.f32 %v1747_v24, %v3570_v56  ;;  %v2022_v29 = vrot.slane %v2008_v31, %v2607_v8 }
 0x12e   :  { %v957_v48 = vmul.f32 %v4312_v17, %v3645_v6  ;;  %v2283_v3 = vrot.slane %v2275_v2, %v2607_v8  ;;  %v428_v18 = vrot.slane %v421_v22, %v2607_v8  ;;  %v699_v4 = vrot.slane %v692_v1, %v2607_v8 }
 0x12f   :  { %v3693_v20 = vadd.f32 %v2015_v38, %v3587_v39  ;;  %v4313_v26 = vstv %s2805_s24  ;;  %v3699_v41 = vadd.f32 %v1754_v10, %v3584_v58  ;;  %v2290_v56 = vrot.slane %v2276_v46, %v2607_v8  ;;  %s3764_s24 = sld [smem:[#allocation6 + $0x47]] }
 0x130   :  { %v960_v59 = vcombine.low %v956_v19, %v957_v48  ;;  %v1224_v21 = vmul.f32 %v4313_v26, %v132_v30  ;;  %v3703_v62 = vadd.f32 %v2283_v3, %v3594_v45  ;;  %v4314_v14 = vmov %v4313_v26 }
 0x131   :  { %v1225_v55 = vmul.f32 %v4314_v14, %v3645_v6  ;;  %v3709_v39 = vadd.f32 %v2022_v29, %v3591_v49  ;;  %v4315_v23 = vstv %s2817_s19  ;;  %v429_v53 = vcombine.high %v428_v18, %v428_v18  ;;  %s3735_s19 = sld [smem:[#allocation6 + $0x3e]] }
 0x132   :  { %v967_v57 = vrot.slane %v960_v59, %v2607_v8  ;;  %v1492_v58 = vmul.f32 %v4315_v23, %v132_v30  ;;  %v4316_v32 = vmov %v4315_v23  ;;  %v436_v45 = vrot.slane %v428_v18, %v2607_v8 }
 0x133   :  { %v1493_v34 = vmul.f32 %v4316_v32, %v3645_v6  ;;  %v1228_v33 = vcombine.low %v1224_v21, %v1225_v55  ;;  %v4317_v11 = vstv %s2827_s18  ;;  %v700_v51 = vcombine.high %v699_v4, %v699_v4  ;;  %s3742_s18 = sld [smem:[#allocation7]] }
 0x134   :  { %v1760_v15 = vmul.f32 %v4317_v11, %v132_v30  ;;  %v968_v49 = vcombine.high %v967_v57, %v967_v57  ;;  %v4318_v47 = vmov %v4317_v11  ;;  %v4319_v60 = vstv %s2833_s16  ;;  %s3749_s16 = sld [smem:[#allocation7 + $0x1]] }
 0x135   :  { %v1496_v5 = vcombine.low %v1492_v58, %v1493_v34  ;;  %v1761_v37 = vmul.f32 %v4318_v47, %v3645_v6  ;;  %v1235_v40 = vrot.slane %v1228_v33, %v2607_v8  ;;  %v2028_v9 = vmul.f32 %v4319_v60, %v132_v30 }
 0x136   :  { %v4320_v35 = vmov %v4319_v60  ;;  %v4321_v0 = vstv %s2839_s30  ;;  %v3738_v31 = vadd.f32 %v2290_v56, %v3598_v50  ;;  %v707_v22 = vrot.slane %v699_v4, %v2607_v8  ;;  %s3759_s30 = sld [smem:[#allocation7 + $0x3]] }
 0x137   :  { %v2029_v2 = vmul.f32 %v4320_v35, %v3645_v6  ;;  %v2296_v27 = vmul.f32 %v4321_v0, %v132_v30  ;;  %v1503_v16 = vrot.slane %v1496_v5, %v2607_v8  ;;  %v1764_v1 = vcombine.low %v1760_v15, %v1761_v37 }
 0x138   :  { %v443_v43 = vrot.slane %v429_v53, %v2607_v8  ;;  %v1236_v19 = vcombine.high %v1235_v40, %v1235_v40  ;;  %v4322_v46 = vmov %v4321_v0  ;;  %v714_v50 = vrot.slane %v700_v51, %v2607_v8 }
 0x139   :  { %v2032_v24 = vcombine.low %v2028_v9, %v2029_v2  ;;  %v2297_v10 = vmul.f32 %v4322_v46, %v3645_v6  ;;  %v975_v30 = vrot.slane %v967_v57, %v2607_v8  ;;  %v1504_v38 = vcombine.high %v1503_v16, %v1503_v16 }
 0x13a   :  { %v1771_v17 = vrot.slane %v1764_v1, %v2607_v8  ;;  %v982_v48 = vrot.slane %v968_v49, %v2607_v8  ;;  %v1243_v29 = vrot.slane %v1235_v40, %v2607_v8  ;;  %v1250_v18 = vrot.slane %v1236_v19, %v2607_v8 }
 0x13b   :  { %v2039_v3 = vrot.slane %v2032_v24, %v2607_v8  ;;  %v2300_v6 = vcombine.low %v2296_v27, %v2297_v10  ;;  %v1511_v4 = vrot.slane %v1503_v16, %v2607_v8  ;;  %v1518_v59 = vrot.slane %v1504_v38, %v2607_v8 }
 0x13c   :  { %v1772_v26 = vcombine.high %v1771_v17, %v1771_v17  ;;  %v1779_v21 = vrot.slane %v1771_v17, %v2607_v8  ;;  %v3772_v57 = vadd.f32 %v436_v45, %v3606_v63  ;;  %v3775_v23 = vadd.f32 %v443_v43, %v3622_v52 }
 0x13d   :  { %v2040_v56 = vcombine.high %v2039_v3, %v2039_v3  ;;  %v2047_v14 = vrot.slane %v2039_v3, %v2607_v8  ;;  %v3769_v55 = vrot.slane %v2300_v6, %v2607_v8  ;;  %v3778_v58 = vadd.f32 %v707_v22, %v3613_v44 }
 0x13e   :  { %v1786_v32 = vrot.slane %v1772_v26, %v2607_v8  ;;  %v3782_v34 = vadd.f32 %v714_v50, %v3632_v54  ;;  %v3785_v53 = vadd.f32 %v975_v30, %v3626_v25  ;;  %v3788_v63 = vadd.f32 %v982_v48, %v3659_v61 }
 0x13f   :  { %v2054_v45 = vrot.slane %v2040_v56, %v2607_v8  ;;  %v3792_v52 = vadd.f32 %v1243_v29, %v3666_v12  ;;  %v3795_v44 = vadd.f32 %v1250_v18, %v3672_v7  ;;  %v3798_v54 = vadd.f32 %v1511_v4, %v3675_v36  ;;  %v137_v7 = vpop.permute.xlu1 %136  ;;  %v135_v36 = vpop.permute.xlu0 %134 }
 0x140   :  { %v3801_v25 = vadd.f32 %v1518_v59, %v3679_v28  ;;  %v3804_v61 = vadd.f32 %v1779_v21, %v3687_v42  ;;  %v3807_v33 = vadd.f32 %v2047_v14, %v3693_v20  ;;  %v2308_v12 = vcombine.high %v3769_v55, %v3769_v55 }
 0x141   :  { %v480_v11 = vstv %s3742_s18  ;;  %v3813_v28 = vadd.f32 %v1786_v32, %v3699_v41  ;;  %v2315_v42 = vrot.slane %v3769_v55, %v2607_v8  ;;  %v751_v15 = vstv %s3749_s16 }
 0x142   :  { %v1019_v20 = vstv %s3754_s20  ;;  %v3820_v51 = vadd.f32 %v2054_v45, %v3709_v39  ;;  %v1287_v49 = vstv %s3759_s30  ;;  %v1523_v5 = vstv %s3720_s25 }
 0x143   :  { %v1791_v47 = vstv %s3725_s17  ;;  %v2059_v37 = vstv %s3735_s19  ;;  %v2327_v40 = vstv %s3764_s24  ;;  %v3829_v41 = vsel %vm138_vm7, %v135_v36, %v137_v7 }
 0x144   :  { %v3833_v60 = vsel %vm138_vm7, %v137_v7, %v135_v36  ;;  %v4323_v9 = vstv %s2845_s4  ;;  %v4325_v0 = vstv %s2851_s22  ;;  %v4327_v1 = vlaneseq  ;;  %s3874_s22 = sld [smem:[#allocation7 + $0x4]] }
 0x145   :  { %v449_v35 = vmul.f32 %v4323_v9, %v3829_v41  ;;  %v4324_v39 = vmov %v4323_v9  ;;  %v720_v27 = vmul.f32 %v4325_v0, %v3829_v41  ;;  %v4326_v22 = vmov %v4325_v0  ;;  %s3886_s4 = sld [smem:[#allocation7 + $0x6]] }
 0x146   :  { %v450_v2 = vmul.f32 %v4324_v39, %v3833_v60  ;;  %v721_v16 = vmul.f32 %v4326_v22, %v3833_v60  ;;  %vm3848_vm8 = vcmp.lt.s32.totalorder %v4327_v1, 256  ;;  %v4330_v13 = vstv %s2859_s1  ;;  %s3878_s1 = sld [smem:[#allocation7 + $0x5]] }
 0x147   :  { %v988_v19 = vmul.f32 %v4330_v13, %v3829_v41  ;;  %v4331_v24 = vmov %v4330_v13  ;;  %v4332_v10 = vstv %s2870_s3  ;;  %v1524_v29 = vmul.f32 %v1523_v5, %v3829_v41  ;;  %s3925_s3 = sld [smem:[#allocation7 + $0x7]] }
 0x148   :  { %v989_v46 = vmul.f32 %v4331_v24, %v3833_v60  ;;  %v1256_v50 = vmul.f32 %v4332_v10, %v3829_v41  ;;  %v4333_v30 = vmov %v4332_v10  ;;  %v453_v17 = vcombine.low %v449_v35, %v450_v2 }
 0x149   :  { %v1257_v38 = vmul.f32 %v4333_v30, %v3833_v60  ;;  %v724_v48 = vcombine.low %v720_v27, %v721_v16  ;;  %v1525_v3 = vmul.f32 %v1523_v5, %v3833_v60  ;;  %v1792_v4 = vmul.f32 %v1791_v47, %v3829_v41 }
 0x14a   :  { %v992_v6 = vcombine.low %v988_v19, %v989_v46  ;;  %v1793_v59 = vmul.f32 %v1791_v47, %v3833_v60  ;;  %v460_v26 = vrot.slane %v453_v17, %v2607_v8  ;;  %v2060_v14 = vmul.f32 %v2059_v37, %v3829_v41 }
 0x14b   :  { %v1260_v18 = vcombine.low %v1256_v50, %v1257_v38  ;;  %v731_v21 = vrot.slane %v724_v48, %v2607_v8  ;;  %v1528_v56 = vcombine.low %v1524_v29, %v1525_v3  ;;  %v2061_v36 = vmul.f32 %v2059_v37, %v3833_v60 }
 0x14c   :  { %v999_v32 = vrot.slane %v992_v6, %v2607_v8  ;;  %v1796_v7 = vcombine.low %v1792_v4, %v1793_v59  ;;  %v461_v5 = vcombine.high %v460_v26, %v460_v26  ;;  %v468_v9 = vrot.slane %v460_v26, %v2607_v8 }
 0x14d   :  { %v1267_v45 = vrot.slane %v1260_v18, %v2607_v8  ;;  %v732_v47 = vcombine.high %v731_v21, %v731_v21  ;;  %v739_v35 = vrot.slane %v731_v21, %v2607_v8  ;;  %v2328_v48 = vmul.f32 %v2327_v40, %v3829_v41 }
 0x14e   :  { %v1000_v39 = vcombine.high %v999_v32, %v999_v32  ;;  %v1007_v2 = vrot.slane %v999_v32, %v2607_v8  ;;  %v475_v37 = vrot.slane %v461_v5, %v2607_v8  ;;  %v478_v22 = vadd.f32 %v468_v9, %v3772_v57 }
 0x14f   :  { %v1268_v0 = vcombine.high %v1267_v45, %v1267_v45  ;;  %v1275_v27 = vrot.slane %v1267_v45, %v2607_v8  ;;  %v746_v16 = vrot.slane %v732_v47, %v2607_v8  ;;  %v749_v1 = vadd.f32 %v739_v35, %v3778_v58 }
 0x150   :  { %v1014_v13 = vrot.slane %v1000_v39, %v2607_v8  ;;  %v1017_v19 = vadd.f32 %v1007_v2, %v3785_v53  ;;  %v479_v10 = vadd.f32 %v475_v37, %v3775_v23  ;;  %v481_v57 = vadd.f32 %v480_v11, %v478_v22 }
 0x151   :  { %v1282_v24 = vrot.slane %v1268_v0, %v2607_v8  ;;  %v1285_v46 = vadd.f32 %v1275_v27, %v3792_v52  ;;  %v750_v50 = vadd.f32 %v746_v16, %v3782_v34  ;;  %v752_v58 = vadd.f32 %v751_v15, %v749_v1 }
 0x152   :  { %v1018_v30 = vadd.f32 %v1014_v13, %v3788_v63  ;;  %v1020_v38 = vadd.f32 %v1019_v20, %v1017_v19  ;;  %v482_v52 = vadd.f32 %v480_v11, %v479_v10  ;;  %487 = vst.msk [vmem:[#allocation9] ss:$8 sm:$0x3] %vm3848_vm8, %v481_v57  ;;  %v1535_v34 = vrot.slane %v1528_v56, %v2607_v8 }
 0x153   :  { %v1286_v53 = vadd.f32 %v1282_v24, %v3795_v44  ;;  %v1288_v17 = vadd.f32 %v1287_v49, %v1285_v46  ;;  %v753_v23 = vadd.f32 %v751_v15, %v750_v50  ;;  %755 = vst.msk [vmem:[#allocation9 + $0x1] ss:$8 sm:$0x3] %vm3848_vm8, %v752_v58  ;;  %v1803_v63 = vrot.slane %v1796_v7, %v2607_v8 }
 0x154   :  { %v1021_v44 = vadd.f32 %v1019_v20, %v1018_v30  ;;  %1023 = vst.msk [vmem:[#allocation9 + $0x2] ss:$8 sm:$0x3] %vm3848_vm8, %v1020_v38  ;;  %v2064_v15 = vcombine.low %v2060_v14, %v2061_v36  ;;  %490 = vst.msk [vmem:[#allocation9 + $0x10] ss:$8 sm:$0x3] %vm3848_vm8, %v482_v52  ;;  %v1536_v20 = vcombine.high %v1535_v34, %v1535_v34  ;;  %v1555_v6 = vstv %s3874_s22 }
 0x155   :  { %v1289_v11 = vadd.f32 %v1287_v49, %v1286_v53  ;;  %1291 = vst.msk [vmem:[#allocation9 + $0x3] ss:$8 sm:$0x3] %vm3848_vm8, %v1288_v17  ;;  %758 = vst.msk [vmem:[#allocation9 + $0x11] ss:$8 sm:$0x3] %vm3848_vm8, %v753_v23  ;;  %v1543_v49 = vrot.slane %v1535_v34, %v2607_v8  ;;  %v1804_v29 = vcombine.high %v1803_v63, %v1803_v63  ;;  %v1823_v18 = vstv %s3878_s1 }
 0x156   :  { %v1811_v3 = vrot.slane %v1803_v63, %v2607_v8  ;;  %1026 = vst.msk [vmem:[#allocation9 + $0x12] ss:$8 sm:$0x3] %vm3848_vm8, %v1021_v44  ;;  %v2071_v41 = vrot.slane %v2064_v15, %v2607_v8  ;;  %v2329_v4 = vmul.f32 %v2327_v40, %v3833_v60  ;;  %v1550_v59 = vrot.slane %v1536_v20, %v2607_v8 }
 0x157   :  { %1294 = vst.msk [vmem:[#allocation9 + $0x13] ss:$8 sm:$0x3] %vm3848_vm8, %v1289_v11  ;;  %v1553_v26 = vadd.f32 %v1543_v49, %v3798_v54  ;;  %v1818_v21 = vrot.slane %v1804_v29, %v2607_v8  ;;  %v2091_v14 = vstv %s3886_s4  ;;  %v2322_v54 = vrot.slane %v2308_v12, %v2607_v8 }
 0x158   :  { %v1821_v56 = vadd.f32 %v1811_v3, %v3804_v61  ;;  %v2072_v32 = vcombine.high %v2071_v41, %v2071_v41  ;;  %v2079_v45 = vrot.slane %v2071_v41, %v2607_v8  ;;  %v2332_v7 = vcombine.low %v2328_v48, %v2329_v4 }
 0x159   :  { %v1554_v36 = vadd.f32 %v1550_v59, %v3801_v25  ;;  %v1556_v5 = vadd.f32 %v1555_v6, %v1553_v26  ;;  %v1822_v9 = vadd.f32 %v1818_v21, %v3813_v28  ;;  %v2325_v25 = vadd.f32 %v2315_v42, %v3703_v62 }
 0x15a   :  { %v1824_v40 = vadd.f32 %v1823_v18, %v1821_v56  ;;  %v2086_v60 = vrot.slane %v2072_v32, %v2607_v8  ;;  %v2089_v61 = vadd.f32 %v2079_v45, %v3807_v33  ;;  %v2339_v47 = vrot.slane %v2332_v7, %v2607_v8 }
 0x15b   :  { %v1557_v35 = vadd.f32 %v1555_v6, %v1554_v36  ;;  %1559 = vst.msk [vmem:[#allocation9 + $0x4] ss:$8 sm:$0x3] %vm3848_vm8, %v1556_v5  ;;  %v1825_v28 = vadd.f32 %v1823_v18, %v1822_v9  ;;  %v2359_v0 = vstv %s3925_s3  ;;  %v2326_v62 = vadd.f32 %v2322_v54, %v3738_v31 }
 0x15c   :  { %1827 = vst.msk [vmem:[#allocation9 + $0x5] ss:$8 sm:$0x3] %vm3848_vm8, %v1824_v40  ;;  %v2090_v12 = vadd.f32 %v2086_v60, %v3820_v51  ;;  %v2092_v39 = vadd.f32 %v2091_v14, %v2089_v61  ;;  %v2340_v2 = vcombine.high %v2339_v47, %v2339_v47  ;;  %v2347_v33 = vrot.slane %v2339_v47, %v2607_v8 }
 0x15d   :  { %1562 = vst.msk [vmem:[#allocation9 + $0x14] ss:$8 sm:$0x3] %vm3848_vm8, %v1557_v35  ;;  %1830 = vst.msk [vmem:[#allocation9 + $0x15] ss:$8 sm:$0x3] %vm3848_vm8, %v1825_v28 }
 0x15e   :  { %v2093_v55 = vadd.f32 %v2091_v14, %v2090_v12  ;;  %2095 = vst.msk [vmem:[#allocation9 + $0x6] ss:$8 sm:$0x3] %vm3848_vm8, %v2092_v39  ;;  %v2354_v42 = vrot.slane %v2340_v2, %v2607_v8  ;;  %v2357_v51 = vadd.f32 %v2347_v33, %v2325_v25 }
 0x160   :  { %2098 = vst.msk [vmem:[#allocation9 + $0x16] ss:$8 sm:$0x3] %vm3848_vm8, %v2093_v55  ;;  %v2358_v27 = vadd.f32 %v2354_v42, %v2326_v62  ;;  %v2360_v37 = vadd.f32 %v2359_v0, %v2357_v51 }
 0x162   :  { %v2361_v22 = vadd.f32 %v2359_v0, %v2358_v27  ;;  %2363 = vst.msk [vmem:[#allocation9 + $0x7] ss:$8 sm:$0x3] %vm3848_vm8, %v2360_v37 }
 0x164   :  { %2366 = vst.msk [vmem:[#allocation9 + $0x17] ss:$8 sm:$0x3] %vm3848_vm8, %v2361_v22 }
 0x165   :  { %2537 = shalt.err (!%p2534_p5)
}
 0x166   :  { %s2569_s23 = smov 256   ;;  %s2570_s8 = smov 16  }
 0x167   :  { %s4334_s10 = sld [smem:[#allocation83_spill]] }
 0x16d   :  { %2379 = dma.vmem_to_hbm [thread:$0]  %s2374_s26, 512, %s4334_s10, [#allocation4], %s2569_s23, %s2569_s23, %s2570_s8  }
 0x16e   :  { %2552 = dma.done.wait [#allocation4], 512  }
 0x16f   :  { %2553 = vsyncadd [#allocation4], 4294966784 }
 0x170   :  { %2383 = vsyncpa [#allocation3], 1 }
 0x171   :  { %2384 = vsyncpa [#allocation4], 1 }
 0x172   :  { %2385 = vsyncpa [#allocation5], 1 }
 0x173   :  { %2386 = vsyncpa [#allocation8], 1 }

</bundles_post_ra>
